<compile_context>
chip_gen: v6e
topology: v6e:2x2x1
jax: 0.10.0
libtpu: 0.0.40
codegen_flags: <defaults>
</compile_context>

<pallas_src>
import functools

import jax
import jax.numpy as jnp
import numpy as np
from jax.experimental import pallas as pl
from jax.experimental.pallas import tpu as pltpu


def _sublane_tile(dtype):
    itemsize = jnp.dtype(dtype).itemsize
    return {4: 8, 2: 16, 1: 32}.get(itemsize, 8)


def _pick_batch_block(n, cap=8):
    """Largest divisor of n <= cap that keeps >= 2 grid steps when n >= 2."""
    limit = min(cap, n if n == 1 else max(1, n // 2))
    best = 1
    for d in range(1, limit + 1):
        if n % d == 0:
            best = d
    return best


def _conv_relu_kernel(x_ref, w_ref, b_ref, o_ref, xc_ref, p_ref, *,
                      b_blk, cin_p, wp, kh_sz, kw_sz, stride, oh, ow, q):
    """Conv2d (+bias) + ReLU for a block of `b_blk` batch elements.

    x_ref : (B_blk, Cin_p, Hp*Wp)   padded input (padding done in wrapper)
    w_ref : (Cout, K)               K = KH*KW*Cin_p, tap-major / channel-minor
    b_ref : (Cout, 1)               bias
    o_ref : (B_blk, Cout, OH*OW)    lane-dense output block
    xc_ref: VMEM (Cin_p, (OH+KH-1)*OW)  per-kw column-compacted rows (stride 1)
    p_ref : VMEM (K, B_blk*OH*OW)   im2col patch matrices, side by side on lanes
    """
    # 1) Build the patch matrices; every write is sublane-tile aligned and the
    #    column count is exactly OH*OW per element (no garbage columns, no
    #    post-matmul trim).
    for b in range(b_blk):
        col0 = b * q
        if stride == 1:
            n_rows = oh + kh_sz - 1
            for kw in range(kw_sz):
                # Compact the touched padded rows for this kernel-column offset.
                for r in range(n_rows):
                    xc_ref[:, r * ow:(r + 1) * ow] = (
                        x_ref[b, :, pl.ds(r * wp + kw, ow)])
                # Each (kh, kw) tap is now ONE contiguous (Cin_p, Q) slice.
                for kh in range(kh_sz):
                    k = kh * kw_sz + kw
                    p_ref[k * cin_p:(k + 1) * cin_p, col0:col0 + q] = (
                        xc_ref[:, kh * ow:kh * ow + q])
        else:
            # TODO(synk): stride>1 uses per-(tap, output-row) strided-lane
            # reads; still yields exactly OH*OW columns (dense output store).
            for kh in range(kh_sz):
                for kw in range(kw_sz):
                    k = kh * kw_sz + kw
                    for i in range(oh):
                        src = (i * stride + kh) * wp + kw
                        p_ref[k * cin_p:(k + 1) * cin_p,
                              col0 + i * ow:col0 + (i + 1) * ow] = (
                                  x_ref[b, :, pl.ds(src, ow, stride=stride)])

    # 2) One MXU contraction over K for all B_blk elements, fused bias + ReLU.
    acc = jnp.dot(w_ref[...], p_ref[...], preferred_element_type=jnp.float32)
    acc = jnp.maximum(acc + b_ref[...].astype(jnp.float32), 0.0)

    # 3) Dense output stores (per-element lane offset is a multiple of Q).
    for b in range(b_blk):
        o_ref[b, :, :] = acc[:, b * q:(b + 1) * q].astype(o_ref.dtype)


def conv_block_forward(x_nchw, weight_oihw, bias, *, stride, padding,
                       batch_block_cap=8):
    """ConvBlock forward: Conv2d(stride, padding, bias=True) + ReLU.

    x_nchw:      (N, Cin, H, W)      -- PyTorch layout
    weight_oihw: (Cout, Cin, KH, KW) -- PyTorch layout
    bias:        (Cout,)
    returns:     (N, Cout, OH, OW)   -- PyTorch layout
    """
    n, cin, h, w = x_nchw.shape
    cout, _, kh_sz, kw_sz = weight_oihw.shape
    s = int(stride)
    ph = pw = int(padding)
    hp, wp = h + 2 * ph, w + 2 * pw
    oh = (hp - kh_sz) // s + 1
    ow = (wp - kw_sz) // s + 1
    q = oh * ow

    # Pallas does not bounds-check VMEM reads: assert im2col stays in bounds.
    assert (oh - 1) * s + kh_sz <= hp, "im2col row read out of bounds"
    assert (ow - 1) * s + kw_sz <= wp, "im2col column read out of bounds"

    # Sublane-tile-pad the channel dim so every patch write is tile aligned.
    sub = _sublane_tile(x_nchw.dtype)
    cin_p = ((cin + sub - 1) // sub) * sub
    k_dim = kh_sz * kw_sz * cin_p

    # Wrapper-side zero padding (spatial + channel); reshape-only after that.
    x_pad = jnp.pad(x_nchw, ((0, 0), (0, cin_p - cin), (ph, ph), (pw, pw)))
    x_flat = x_pad.reshape(n, cin_p, hp * wp)

    # Weights: (Cout, KH, KW, Cin_p) tap-major / channel-minor, zero K-pad rows
    # (so the uninitialized-looking padded channels contribute nothing).
    w_t = jnp.transpose(weight_oihw, (0, 2, 3, 1))
    w_t = jnp.pad(w_t, ((0, 0), (0, 0), (0, 0), (0, cin_p - cin)))
    w_mat = w_t.reshape(cout, k_dim)
    b_col = bias.reshape(cout, 1).astype(jnp.float32)

    b_blk = _pick_batch_block(n, cap=batch_block_cap)
    assert n % b_blk == 0
    grid = (n // b_blk,)

    kernel = functools.partial(
        _conv_relu_kernel,
        b_blk=b_blk, cin_p=cin_p, wp=wp,
        kh_sz=kh_sz, kw_sz=kw_sz, stride=s, oh=oh, ow=ow, q=q)

    xc_lanes = (oh + kh_sz - 1) * ow   # only used on the stride-1 path

    out_flat = pl.pallas_call(
        kernel,
        out_shape=jax.ShapeDtypeStruct((n, cout, q), x_nchw.dtype),
        grid_spec=pltpu.PrefetchScalarGridSpec(
            num_scalar_prefetch=0,
            grid=grid,
            in_specs=[
                pl.BlockSpec((b_blk, cin_p, hp * wp), lambda g: (g, 0, 0)),
                pl.BlockSpec((cout, k_dim), lambda g: (0, 0)),
                pl.BlockSpec((cout, 1), lambda g: (0, 0)),
            ],
            out_specs=pl.BlockSpec((b_blk, cout, q), lambda g: (g, 0, 0)),
            scratch_shapes=[
                pltpu.VMEM((cin_p, xc_lanes), x_nchw.dtype),
                pltpu.VMEM((k_dim, b_blk * q), x_nchw.dtype),
            ],
        ),
        compiler_params=pltpu.CompilerParams(
            dimension_semantics=("parallel",)),
    )(x_flat, w_mat, b_col)

    # Free reshape back to NCHW (no transpose, no extra HBM round trip).
    return out_flat.reshape(n, cout, oh, ow)


if __name__ == "__main__":
    # ConvBlock(in_channels=4, out_channels=8, kernel_size=3, stride=1, padding=1)
    N, CIN, H, W = 2, 4, 16, 16
    COUT, KH, KW = 8, 3, 3
    STRIDE, PADDING = 1, 1

    key = jax.random.PRNGKey(0)
    kx, kw_, kb = jax.random.split(key, 3)
    x = jax.random.normal(kx, (N, CIN, H, W), dtype=jnp.float32)
    weight = jax.random.normal(kw_, (COUT, CIN, KH, KW), dtype=jnp.float32) * 0.1
    bias = jax.random.normal(kb, (COUT,), dtype=jnp.float32) * 0.1

    out = conv_block_forward(x, weight, bias, stride=STRIDE, padding=PADDING)
    out = jax.block_until_ready(out)

    # Silent correctness check against XLA's native conv + ReLU.
    ref = jax.lax.conv_general_dilated(
        x, weight, window_strides=(STRIDE, STRIDE),
        padding=((PADDING, PADDING), (PADDING, PADDING)),
        dimension_numbers=("NCHW", "OIHW", "NCHW"))
    ref = jnp.maximum(ref + bias[None, :, None, None], 0.0)
    assert out.shape == (N, COUT, H, W)
    np.testing.assert_allclose(np.asarray(out), np.asarray(ref),
                               rtol=1e-5, atol=1e-5)

    print("KERNEL_OK")
</pallas_src>

<mosaic_0001>
module attributes {stable_mosaic.version = 11 : i64} {
  func.func @_conv_relu_kernel(%arg0: i32, %arg1: memref<1x8x324xf32, #tpu.memory_space<vmem>>, %arg2: memref<8x72xf32, #tpu.memory_space<vmem>>, %arg3: memref<8x1xf32, #tpu.memory_space<vmem>>, %arg4: memref<1x8x256xf32, #tpu.memory_space<vmem>>, %arg5: memref<8x288xf32, #tpu.memory_space<vmem>>, %arg6: memref<72x256xf32, #tpu.memory_space<vmem>>) attributes {dimension_semantics = [#tpu.dimension_semantics<parallel>], iteration_bounds = array<i64: 2>, scalar_prefetch = 0 : i64, scratch_operands = 2 : i64, tpu.core_type = #tpu.core_type<tc>, window_params = [{transform_indices = @transform_0, window_bounds = array<i64: 1, 8, 324>}, {pipeline_mode = #tpu.pipeline_mode<synchronous>, transform_indices = @transform_1, window_bounds = array<i64: 8, 72>}, {pipeline_mode = #tpu.pipeline_mode<synchronous>, transform_indices = @transform_2, window_bounds = array<i64: 8, 1>}, {transform_indices = @transform_3, window_bounds = array<i64: 1, 8, 256>}]} {
    %c0 = arith.constant 0 : index
    %c0_0 = arith.constant 0 : index
    %c0_1 = arith.constant 0 : index
    %0 = vector.load %arg1[%c0, %c0_0, %c0_1] : memref<1x8x324xf32, #tpu.memory_space<vmem>>, vector<1x8x16xf32>
    %1 = vector.shape_cast %0 : vector<1x8x16xf32> to vector<8x16xf32>
    %c0_2 = arith.constant 0 : index
    %c0_3 = arith.constant 0 : index
    %2 = vector.load %arg5[%c0_2, %c0_3] : memref<8x288xf32, #tpu.memory_space<vmem>>, vector<8x16xf32>
    tpu.vector_store %arg5[%c0_2, %c0_3], %1 {strides = array<i32>} : memref<8x288xf32, #tpu.memory_space<vmem>>, vector<8x16xf32>,
    %c0_4 = arith.constant 0 : index
    %c0_5 = arith.constant 0 : index
    %c18 = arith.constant 18 : index
    %3 = vector.load %arg1[%c0_4, %c0_5, %c18] : memref<1x8x324xf32, #tpu.memory_space<vmem>>, vector<1x8x16xf32>
    %4 = vector.shape_cast %3 : vector<1x8x16xf32> to vector<8x16xf32>
    %c0_6 = arith.constant 0 : index
    %c16 = arith.constant 16 : index
    %5 = vector.load %arg5[%c0_6, %c16] : memref<8x288xf32, #tpu.memory_space<vmem>>, vector<8x16xf32>
    tpu.vector_store %arg5[%c0_6, %c16], %4 {strides = array<i32>} : memref<8x288xf32, #tpu.memory_space<vmem>>, vector<8x16xf32>,
    %c0_7 = arith.constant 0 : index
    %c0_8 = arith.constant 0 : index
    %c36 = arith.constant 36 : index
    %6 = vector.load %arg1[%c0_7, %c0_8, %c36] : memref<1x8x324xf32, #tpu.memory_space<vmem>>, vector<1x8x16xf32>
    %7 = vector.shape_cast %6 : vector<1x8x16xf32> to vector<8x16xf32>
    %c0_9 = arith.constant 0 : index
    %c32 = arith.constant 32 : index
    %8 = vector.load %arg5[%c0_9, %c32] : memref<8x288xf32, #tpu.memory_space<vmem>>, vector<8x16xf32>
    tpu.vector_store %arg5[%c0_9, %c32], %7 {strides = array<i32>} : memref<8x288xf32, #tpu.memory_space<vmem>>, vector<8x16xf32>,
    %c0_10 = arith.constant 0 : index
    %c0_11 = arith.constant 0 : index
    %c54 = arith.constant 54 : index
    %9 = vector.load %arg1[%c0_10, %c0_11, %c54] : memref<1x8x324xf32, #tpu.memory_space<vmem>>, vector<1x8x16xf32>
    %10 = vector.shape_cast %9 : vector<1x8x16xf32> to vector<8x16xf32>
    %c0_12 = arith.constant 0 : index
    %c48 = arith.constant 48 : index
    %11 = vector.load %arg5[%c0_12, %c48] : memref<8x288xf32, #tpu.memory_space<vmem>>, vector<8x16xf32>
    tpu.vector_store %arg5[%c0_12, %c48], %10 {strides = array<i32>} : memref<8x288xf32, #tpu.memory_space<vmem>>, vector<8x16xf32>,
    %c0_13 = arith.constant 0 : index
    %c0_14 = arith.constant 0 : index
    %c72 = arith.constant 72 : index
    %12 = vector.load %arg1[%c0_13, %c0_14, %c72] : memref<1x8x324xf32, #tpu.memory_space<vmem>>, vector<1x8x16xf32>
    %13 = vector.shape_cast %12 : vector<1x8x16xf32> to vector<8x16xf32>
    %c0_15 = arith.constant 0 : index
    %c64 = arith.constant 64 : index
    %14 = vector.load %arg5[%c0_15, %c64] : memref<8x288xf32, #tpu.memory_space<vmem>>, vector<8x16xf32>
    tpu.vector_store %arg5[%c0_15, %c64], %13 {strides = array<i32>} : memref<8x288xf32, #tpu.memory_space<vmem>>, vector<8x16xf32>,
    %c0_16 = arith.constant 0 : index
    %c0_17 = arith.constant 0 : index
    %c90 = arith.constant 90 : index
    %15 = vector.load %arg1[%c0_16, %c0_17, %c90] : memref<1x8x324xf32, #tpu.memory_space<vmem>>, vector<1x8x16xf32>
    %16 = vector.shape_cast %15 : vector<1x8x16xf32> to vector<8x16xf32>
    %c0_18 = arith.constant 0 : index
    %c80 = arith.constant 80 : index
    %17 = vector.load %arg5[%c0_18, %c80] : memref<8x288xf32, #tpu.memory_space<vmem>>, vector<8x16xf32>
    tpu.vector_store %arg5[%c0_18, %c80], %16 {strides = array<i32>} : memref<8x288xf32, #tpu.memory_space<vmem>>, vector<8x16xf32>,
    %c0_19 = arith.constant 0 : index
    %c0_20 = arith.constant 0 : index
    %c108 = arith.constant 108 : index
    %18 = vector.load %arg1[%c0_19, %c0_20, %c108] : memref<1x8x324xf32, #tpu.memory_space<vmem>>, vector<1x8x16xf32>
    %19 = vector.shape_cast %18 : vector<1x8x16xf32> to vector<8x16xf32>
    %c0_21 = arith.constant 0 : index
    %c96 = arith.constant 96 : index
    %20 = vector.load %arg5[%c0_21, %c96] : memref<8x288xf32, #tpu.memory_space<vmem>>, vector<8x16xf32>
    tpu.vector_store %arg5[%c0_21, %c96], %19 {strides = array<i32>} : memref<8x288xf32, #tpu.memory_space<vmem>>, vector<8x16xf32>,
    %c0_22 = arith.constant 0 : index
    %c0_23 = arith.constant 0 : index
    %c126 = arith.constant 126 : index
    %21 = vector.load %arg1[%c0_22, %c0_23, %c126] : memref<1x8x324xf32, #tpu.memory_space<vmem>>, vector<1x8x16xf32>
    %22 = vector.shape_cast %21 : vector<1x8x16xf32> to vector<8x16xf32>
    %c0_24 = arith.constant 0 : index
    %c112 = arith.constant 112 : index
    %23 = vector.load %arg5[%c0_24, %c112] : memref<8x288xf32, #tpu.memory_space<vmem>>, vector<8x16xf32>
    tpu.vector_store %arg5[%c0_24, %c112], %22 {strides = array<i32>} : memref<8x288xf32, #tpu.memory_space<vmem>>, vector<8x16xf32>,
    %c0_25 = arith.constant 0 : index
    %c0_26 = arith.constant 0 : index
    %c144 = arith.constant 144 : index
    %24 = vector.load %arg1[%c0_25, %c0_26, %c144] : memref<1x8x324xf32, #tpu.memory_space<vmem>>, vector<1x8x16xf32>
    %25 = vector.shape_cast %24 : vector<1x8x16xf32> to vector<8x16xf32>
    %c0_27 = arith.constant 0 : index
    %c128 = arith.constant 128 : index
    %26 = vector.load %arg5[%c0_27, %c128] : memref<8x288xf32, #tpu.memory_space<vmem>>, vector<8x16xf32>
    tpu.vector_store %arg5[%c0_27, %c128], %25 {strides = array<i32>} : memref<8x288xf32, #tpu.memory_space<vmem>>, vector<8x16xf32>,
    %c0_28 = arith.constant 0 : index
    %c0_29 = arith.constant 0 : index
    %c162 = arith.constant 162 : index
    %27 = vector.load %arg1[%c0_28, %c0_29, %c162] : memref<1x8x324xf32, #tpu.memory_space<vmem>>, vector<1x8x16xf32>
    %28 = vector.shape_cast %27 : vector<1x8x16xf32> to vector<8x16xf32>
    %c0_30 = arith.constant 0 : index
    %c144_31 = arith.constant 144 : index
    %29 = vector.load %arg5[%c0_30, %c144_31] : memref<8x288xf32, #tpu.memory_space<vmem>>, vector<8x16xf32>
    tpu.vector_store %arg5[%c0_30, %c144_31], %28 {strides = array<i32>} : memref<8x288xf32, #tpu.memory_space<vmem>>, vector<8x16xf32>,
    %c0_32 = arith.constant 0 : index
    %c0_33 = arith.constant 0 : index
    %c180 = arith.constant 180 : index
    %30 = vector.load %arg1[%c0_32, %c0_33, %c180] : memref<1x8x324xf32, #tpu.memory_space<vmem>>, vector<1x8x16xf32>
    %31 = vector.shape_cast %30 : vector<1x8x16xf32> to vector<8x16xf32>
    %c0_34 = arith.constant 0 : index
    %c160 = arith.constant 160 : index
    %32 = vector.load %arg5[%c0_34, %c160] : memref<8x288xf32, #tpu.memory_space<vmem>>, vector<8x16xf32>
    tpu.vector_store %arg5[%c0_34, %c160], %31 {strides = array<i32>} : memref<8x288xf32, #tpu.memory_space<vmem>>, vector<8x16xf32>,
    %c0_35 = arith.constant 0 : index
    %c0_36 = arith.constant 0 : index
    %c198 = arith.constant 198 : index
    %33 = vector.load %arg1[%c0_35, %c0_36, %c198] : memref<1x8x324xf32, #tpu.memory_space<vmem>>, vector<1x8x16xf32>
    %34 = vector.shape_cast %33 : vector<1x8x16xf32> to vector<8x16xf32>
    %c0_37 = arith.constant 0 : index
    %c176 = arith.constant 176 : index
    %35 = vector.load %arg5[%c0_37, %c176] : memref<8x288xf32, #tpu.memory_space<vmem>>, vector<8x16xf32>
    tpu.vector_store %arg5[%c0_37, %c176], %34 {strides = array<i32>} : memref<8x288xf32, #tpu.memory_space<vmem>>, vector<8x16xf32>,
    %c0_38 = arith.constant 0 : index
    %c0_39 = arith.constant 0 : index
    %c216 = arith.constant 216 : index
    %36 = vector.load %arg1[%c0_38, %c0_39, %c216] : memref<1x8x324xf32, #tpu.memory_space<vmem>>, vector<1x8x16xf32>
    %37 = vector.shape_cast %36 : vector<1x8x16xf32> to vector<8x16xf32>
    %c0_40 = arith.constant 0 : index
    %c192 = arith.constant 192 : index
    %38 = vector.load %arg5[%c0_40, %c192] : memref<8x288xf32, #tpu.memory_space<vmem>>, vector<8x16xf32>
    tpu.vector_store %arg5[%c0_40, %c192], %37 {strides = array<i32>} : memref<8x288xf32, #tpu.memory_space<vmem>>, vector<8x16xf32>,
    %c0_41 = arith.constant 0 : index
    %c0_42 = arith.constant 0 : index
    %c234 = arith.constant 234 : index
    %39 = vector.load %arg1[%c0_41, %c0_42, %c234] : memref<1x8x324xf32, #tpu.memory_space<vmem>>, vector<1x8x16xf32>
    %40 = vector.shape_cast %39 : vector<1x8x16xf32> to vector<8x16xf32>
    %c0_43 = arith.constant 0 : index
    %c208 = arith.constant 208 : index
    %41 = vector.load %arg5[%c0_43, %c208] : memref<8x288xf32, #tpu.memory_space<vmem>>, vector<8x16xf32>
    tpu.vector_store %arg5[%c0_43, %c208], %40 {strides = array<i32>} : memref<8x288xf32, #tpu.memory_space<vmem>>, vector<8x16xf32>,
    %c0_44 = arith.constant 0 : index
    %c0_45 = arith.constant 0 : index
    %c252 = arith.constant 252 : index
    %42 = vector.load %arg1[%c0_44, %c0_45, %c252] : memref<1x8x324xf32, #tpu.memory_space<vmem>>, vector<1x8x16xf32>
    %43 = vector.shape_cast %42 : vector<1x8x16xf32> to vector<8x16xf32>
    %c0_46 = arith.constant 0 : index
    %c224 = arith.constant 224 : index
    %44 = vector.load %arg5[%c0_46, %c224] : memref<8x288xf32, #tpu.memory_space<vmem>>, vector<8x16xf32>
    tpu.vector_store %arg5[%c0_46, %c224], %43 {strides = array<i32>} : memref<8x288xf32, #tpu.memory_space<vmem>>, vector<8x16xf32>,
    %c0_47 = arith.constant 0 : index
    %c0_48 = arith.constant 0 : index
    %c270 = arith.constant 270 : index
    %45 = vector.load %arg1[%c0_47, %c0_48, %c270] : memref<1x8x324xf32, #tpu.memory_space<vmem>>, vector<1x8x16xf32>
    %46 = vector.shape_cast %45 : vector<1x8x16xf32> to vector<8x16xf32>
    %c0_49 = arith.constant 0 : index
    %c240 = arith.constant 240 : index
    %47 = vector.load %arg5[%c0_49, %c240] : memref<8x288xf32, #tpu.memory_space<vmem>>, vector<8x16xf32>
    tpu.vector_store %arg5[%c0_49, %c240], %46 {strides = array<i32>} : memref<8x288xf32, #tpu.memory_space<vmem>>, vector<8x16xf32>,
    %c0_50 = arith.constant 0 : index
    %c0_51 = arith.constant 0 : index
    %c288 = arith.constant 288 : index
    %48 = vector.load %arg1[%c0_50, %c0_51, %c288] : memref<1x8x324xf32, #tpu.memory_space<vmem>>, vector<1x8x16xf32>
    %49 = vector.shape_cast %48 : vector<1x8x16xf32> to vector<8x16xf32>
    %c0_52 = arith.constant 0 : index
    %c256 = arith.constant 256 : index
    %50 = vector.load %arg5[%c0_52, %c256] : memref<8x288xf32, #tpu.memory_space<vmem>>, vector<8x16xf32>
    tpu.vector_store %arg5[%c0_52, %c256], %49 {strides = array<i32>} : memref<8x288xf32, #tpu.memory_space<vmem>>, vector<8x16xf32>,
    %c0_53 = arith.constant 0 : index
    %c0_54 = arith.constant 0 : index
    %c306 = arith.constant 306 : index
    %51 = vector.load %arg1[%c0_53, %c0_54, %c306] : memref<1x8x324xf32, #tpu.memory_space<vmem>>, vector<1x8x16xf32>
    %52 = vector.shape_cast %51 : vector<1x8x16xf32> to vector<8x16xf32>
    %c0_55 = arith.constant 0 : index
    %c272 = arith.constant 272 : index
    %53 = vector.load %arg5[%c0_55, %c272] : memref<8x288xf32, #tpu.memory_space<vmem>>, vector<8x16xf32>
    tpu.vector_store %arg5[%c0_55, %c272], %52 {strides = array<i32>} : memref<8x288xf32, #tpu.memory_space<vmem>>, vector<8x16xf32>,
    %c0_56 = arith.constant 0 : index
    %c0_57 = arith.constant 0 : index
    %54 = vector.load %arg5[%c0_56, %c0_57] : memref<8x288xf32, #tpu.memory_space<vmem>>, vector<8x256xf32>
    %c0_58 = arith.constant 0 : index
    %c0_59 = arith.constant 0 : index
    %55 = vector.load %arg6[%c0_58, %c0_59] : memref<72x256xf32, #tpu.memory_space<vmem>>, vector<8x256xf32>
    tpu.vector_store %arg6[%c0_58, %c0_59], %54 {strides = array<i32>} : memref<72x256xf32, #tpu.memory_space<vmem>>, vector<8x256xf32>,
    %c0_60 = arith.constant 0 : index
    %c16_61 = arith.constant 16 : index
    %56 = vector.load %arg5[%c0_60, %c16_61] : memref<8x288xf32, #tpu.memory_space<vmem>>, vector<8x256xf32>
    %c24 = arith.constant 24 : index
    %c0_62 = arith.constant 0 : index
    %57 = vector.load %arg6[%c24, %c0_62] : memref<72x256xf32, #tpu.memory_space<vmem>>, vector<8x256xf32>
    tpu.vector_store %arg6[%c24, %c0_62], %56 {strides = array<i32>} : memref<72x256xf32, #tpu.memory_space<vmem>>, vector<8x256xf32>,
    %c0_63 = arith.constant 0 : index
    %c32_64 = arith.constant 32 : index
    %58 = vector.load %arg5[%c0_63, %c32_64] : memref<8x288xf32, #tpu.memory_space<vmem>>, vector<8x256xf32>
    %c48_65 = arith.constant 48 : index
    %c0_66 = arith.constant 0 : index
    %59 = vector.load %arg6[%c48_65, %c0_66] : memref<72x256xf32, #tpu.memory_space<vmem>>, vector<8x256xf32>
    tpu.vector_store %arg6[%c48_65, %c0_66], %58 {strides = array<i32>} : memref<72x256xf32, #tpu.memory_space<vmem>>, vector<8x256xf32>,
    %c0_67 = arith.constant 0 : index
    %c0_68 = arith.constant 0 : index
    %c1 = arith.constant 1 : index
    %60 = vector.load %arg1[%c0_67, %c0_68, %c1] : memref<1x8x324xf32, #tpu.memory_space<vmem>>, vector<1x8x16xf32>
    %61 = vector.shape_cast %60 : vector<1x8x16xf32> to vector<8x16xf32>
    %c0_69 = arith.constant 0 : index
    %c0_70 = arith.constant 0 : index
    %62 = vector.load %arg5[%c0_69, %c0_70] : memref<8x288xf32, #tpu.memory_space<vmem>>, vector<8x16xf32>
    tpu.vector_store %arg5[%c0_69, %c0_70], %61 {strides = array<i32>} : memref<8x288xf32, #tpu.memory_space<vmem>>, vector<8x16xf32>,
    %c0_71 = arith.constant 0 : index
    %c0_72 = arith.constant 0 : index
    %c19 = arith.constant 19 : index
    %63 = vector.load %arg1[%c0_71, %c0_72, %c19] : memref<1x8x324xf32, #tpu.memory_space<vmem>>, vector<1x8x16xf32>
    %64 = vector.shape_cast %63 : vector<1x8x16xf32> to vector<8x16xf32>
    %c0_73 = arith.constant 0 : index
    %c16_74 = arith.constant 16 : index
    %65 = vector.load %arg5[%c0_73, %c16_74] : memref<8x288xf32, #tpu.memory_space<vmem>>, vector<8x16xf32>
    tpu.vector_store %arg5[%c0_73, %c16_74], %64 {strides = array<i32>} : memref<8x288xf32, #tpu.memory_space<vmem>>, vector<8x16xf32>,
    %c0_75 = arith.constant 0 : index
    %c0_76 = arith.constant 0 : index
    %c37 = arith.constant 37 : index
    %66 = vector.load %arg1[%c0_75, %c0_76, %c37] : memref<1x8x324xf32, #tpu.memory_space<vmem>>, vector<1x8x16xf32>
    %67 = vector.shape_cast %66 : vector<1x8x16xf32> to vector<8x16xf32>
    %c0_77 = arith.constant 0 : index
    %c32_78 = arith.constant 32 : index
    %68 = vector.load %arg5[%c0_77, %c32_78] : memref<8x288xf32, #tpu.memory_space<vmem>>, vector<8x16xf32>
    tpu.vector_store %arg5[%c0_77, %c32_78], %67 {strides = array<i32>} : memref<8x288xf32, #tpu.memory_space<vmem>>, vector<8x16xf32>,
    %c0_79 = arith.constant 0 : index
    %c0_80 = arith.constant 0 : index
    %c55 = arith.constant 55 : index
    %69 = vector.load %arg1[%c0_79, %c0_80, %c55] : memref<1x8x324xf32, #tpu.memory_space<vmem>>, vector<1x8x16xf32>
    %70 = vector.shape_cast %69 : vector<1x8x16xf32> to vector<8x16xf32>
    %c0_81 = arith.constant 0 : index
    %c48_82 = arith.constant 48 : index
    %71 = vector.load %arg5[%c0_81, %c48_82] : memref<8x288xf32, #tpu.memory_space<vmem>>, vector<8x16xf32>
    tpu.vector_store %arg5[%c0_81, %c48_82], %70 {strides = array<i32>} : memref<8x288xf32, #tpu.memory_space<vmem>>, vector<8x16xf32>,
    %c0_83 = arith.constant 0 : index
    %c0_84 = arith.constant 0 : index
    %c73 = arith.constant 73 : index
    %72 = vector.load %arg1[%c0_83, %c0_84, %c73] : memref<1x8x324xf32, #tpu.memory_space<vmem>>, vector<1x8x16xf32>
    %73 = vector.shape_cast %72 : vector<1x8x16xf32> to vector<8x16xf32>
    %c0_85 = arith.constant 0 : index
    %c64_86 = arith.constant 64 : index
    %74 = vector.load %arg5[%c0_85, %c64_86] : memref<8x288xf32, #tpu.memory_space<vmem>>, vector<8x16xf32>
    tpu.vector_store %arg5[%c0_85, %c64_86], %73 {strides = array<i32>} : memref<8x288xf32, #tpu.memory_space<vmem>>, vector<8x16xf32>,
    %c0_87 = arith.constant 0 : index
    %c0_88 = arith.constant 0 : index
    %c91 = arith.constant 91 : index
    %75 = vector.load %arg1[%c0_87, %c0_88, %c91] : memref<1x8x324xf32, #tpu.memory_space<vmem>>, vector<1x8x16xf32>
    %76 = vector.shape_cast %75 : vector<1x8x16xf32> to vector<8x16xf32>
    %c0_89 = arith.constant 0 : index
    %c80_90 = arith.constant 80 : index
    %77 = vector.load %arg5[%c0_89, %c80_90] : memref<8x288xf32, #tpu.memory_space<vmem>>, vector<8x16xf32>
    tpu.vector_store %arg5[%c0_89, %c80_90], %76 {strides = array<i32>} : memref<8x288xf32, #tpu.memory_space<vmem>>, vector<8x16xf32>,
    %c0_91 = arith.constant 0 : index
    %c0_92 = arith.constant 0 : index
    %c109 = arith.constant 109 : index
    %78 = vector.load %arg1[%c0_91, %c0_92, %c109] : memref<1x8x324xf32, #tpu.memory_space<vmem>>, vector<1x8x16xf32>
    %79 = vector.shape_cast %78 : vector<1x8x16xf32> to vector<8x16xf32>
    %c0_93 = arith.constant 0 : index
    %c96_94 = arith.constant 96 : index
    %80 = vector.load %arg5[%c0_93, %c96_94] : memref<8x288xf32, #tpu.memory_space<vmem>>, vector<8x16xf32>
    tpu.vector_store %arg5[%c0_93, %c96_94], %79 {strides = array<i32>} : memref<8x288xf32, #tpu.memory_space<vmem>>, vector<8x16xf32>,
    %c0_95 = arith.constant 0 : index
    %c0_96 = arith.constant 0 : index
    %c127 = arith.constant 127 : index
    %81 = vector.load %arg1[%c0_95, %c0_96, %c127] : memref<1x8x324xf32, #tpu.memory_space<vmem>>, vector<1x8x16xf32>
    %82 = vector.shape_cast %81 : vector<1x8x16xf32> to vector<8x16xf32>
    %c0_97 = arith.constant 0 : index
    %c112_98 = arith.constant 112 : index
    %83 = vector.load %arg5[%c0_97, %c112_98] : memref<8x288xf32, #tpu.memory_space<vmem>>, vector<8x16xf32>
    tpu.vector_store %arg5[%c0_97, %c112_98], %82 {strides = array<i32>} : memref<8x288xf32, #tpu.memory_space<vmem>>, vector<8x16xf32>,
    %c0_99 = arith.constant 0 : index
    %c0_100 = arith.constant 0 : index
    %c145 = arith.constant 145 : index
    %84 = vector.load %arg1[%c0_99, %c0_100, %c145] : memref<1x8x324xf32, #tpu.memory_space<vmem>>, vector<1x8x16xf32>
    %85 = vector.shape_cast %84 : vector<1x8x16xf32> to vector<8x16xf32>
    %c0_101 = arith.constant 0 : index
    %c128_102 = arith.constant 128 : index
    %86 = vector.load %arg5[%c0_101, %c128_102] : memref<8x288xf32, #tpu.memory_space<vmem>>, vector<8x16xf32>
    tpu.vector_store %arg5[%c0_101, %c128_102], %85 {strides = array<i32>} : memref<8x288xf32, #tpu.memory_space<vmem>>, vector<8x16xf32>,
    %c0_103 = arith.constant 0 : index
    %c0_104 = arith.constant 0 : index
    %c163 = arith.constant 163 : index
    %87 = vector.load %arg1[%c0_103, %c0_104, %c163] : memref<1x8x324xf32, #tpu.memory_space<vmem>>, vector<1x8x16xf32>
    %88 = vector.shape_cast %87 : vector<1x8x16xf32> to vector<8x16xf32>
    %c0_105 = arith.constant 0 : index
    %c144_106 = arith.constant 144 : index
    %89 = vector.load %arg5[%c0_105, %c144_106] : memref<8x288xf32, #tpu.memory_space<vmem>>, vector<8x16xf32>
    tpu.vector_store %arg5[%c0_105, %c144_106], %88 {strides = array<i32>} : memref<8x288xf32, #tpu.memory_space<vmem>>, vector<8x16xf32>,
    %c0_107 = arith.constant 0 : index
    %c0_108 = arith.constant 0 : index
    %c181 = arith.constant 181 : index
    %90 = vector.load %arg1[%c0_107, %c0_108, %c181] : memref<1x8x324xf32, #tpu.memory_space<vmem>>, vector<1x8x16xf32>
    %91 = vector.shape_cast %90 : vector<1x8x16xf32> to vector<8x16xf32>
    %c0_109 = arith.constant 0 : index
    %c160_110 = arith.constant 160 : index
    %92 = vector.load %arg5[%c0_109, %c160_110] : memref<8x288xf32, #tpu.memory_space<vmem>>, vector<8x16xf32>
    tpu.vector_store %arg5[%c0_109, %c160_110], %91 {strides = array<i32>} : memref<8x288xf32, #tpu.memory_space<vmem>>, vector<8x16xf32>,
    %c0_111 = arith.constant 0 : index
    %c0_112 = arith.constant 0 : index
    %c199 = arith.constant 199 : index
    %93 = vector.load %arg1[%c0_111, %c0_112, %c199] : memref<1x8x324xf32, #tpu.memory_space<vmem>>, vector<1x8x16xf32>
    %94 = vector.shape_cast %93 : vector<1x8x16xf32> to vector<8x16xf32>
    %c0_113 = arith.constant 0 : index
    %c176_114 = arith.constant 176 : index
    %95 = vector.load %arg5[%c0_113, %c176_114] : memref<8x288xf32, #tpu.memory_space<vmem>>, vector<8x16xf32>
    tpu.vector_store %arg5[%c0_113, %c176_114], %94 {strides = array<i32>} : memref<8x288xf32, #tpu.memory_space<vmem>>, vector<8x16xf32>,
    %c0_115 = arith.constant 0 : index
    %c0_116 = arith.constant 0 : index
    %c217 = arith.constant 217 : index
    %96 = vector.load %arg1[%c0_115, %c0_116, %c217] : memref<1x8x324xf32, #tpu.memory_space<vmem>>, vector<1x8x16xf32>
    %97 = vector.shape_cast %96 : vector<1x8x16xf32> to vector<8x16xf32>
    %c0_117 = arith.constant 0 : index
    %c192_118 = arith.constant 192 : index
    %98 = vector.load %arg5[%c0_117, %c192_118] : memref<8x288xf32, #tpu.memory_space<vmem>>, vector<8x16xf32>
    tpu.vector_store %arg5[%c0_117, %c192_118], %97 {strides = array<i32>} : memref<8x288xf32, #tpu.memory_space<vmem>>, vector<8x16xf32>,
    %c0_119 = arith.constant 0 : index
    %c0_120 = arith.constant 0 : index
    %c235 = arith.constant 235 : index
    %99 = vector.load %arg1[%c0_119, %c0_120, %c235] : memref<1x8x324xf32, #tpu.memory_space<vmem>>, vector<1x8x16xf32>
    %100 = vector.shape_cast %99 : vector<1x8x16xf32> to vector<8x16xf32>
    %c0_121 = arith.constant 0 : index
    %c208_122 = arith.constant 208 : index
    %101 = vector.load %arg5[%c0_121, %c208_122] : memref<8x288xf32, #tpu.memory_space<vmem>>, vector<8x16xf32>
    tpu.vector_store %arg5[%c0_121, %c208_122], %100 {strides = array<i32>} : memref<8x288xf32, #tpu.memory_space<vmem>>, vector<8x16xf32>,
    %c0_123 = arith.constant 0 : index
    %c0_124 = arith.constant 0 : index
    %c253 = arith.constant 253 : index
    %102 = vector.load %arg1[%c0_123, %c0_124, %c253] : memref<1x8x324xf32, #tpu.memory_space<vmem>>, vector<1x8x16xf32>
    %103 = vector.shape_cast %102 : vector<1x8x16xf32> to vector<8x16xf32>
    %c0_125 = arith.constant 0 : index
    %c224_126 = arith.constant 224 : index
    %104 = vector.load %arg5[%c0_125, %c224_126] : memref<8x288xf32, #tpu.memory_space<vmem>>, vector<8x16xf32>
    tpu.vector_store %arg5[%c0_125, %c224_126], %103 {strides = array<i32>} : memref<8x288xf32, #tpu.memory_space<vmem>>, vector<8x16xf32>,
    %c0_127 = arith.constant 0 : index
    %c0_128 = arith.constant 0 : index
    %c271 = arith.constant 271 : index
    %105 = vector.load %arg1[%c0_127, %c0_128, %c271] : memref<1x8x324xf32, #tpu.memory_space<vmem>>, vector<1x8x16xf32>
    %106 = vector.shape_cast %105 : vector<1x8x16xf32> to vector<8x16xf32>
    %c0_129 = arith.constant 0 : index
    %c240_130 = arith.constant 240 : index
    %107 = vector.load %arg5[%c0_129, %c240_130] : memref<8x288xf32, #tpu.memory_space<vmem>>, vector<8x16xf32>
    tpu.vector_store %arg5[%c0_129, %c240_130], %106 {strides = array<i32>} : memref<8x288xf32, #tpu.memory_space<vmem>>, vector<8x16xf32>,
    %c0_131 = arith.constant 0 : index
    %c0_132 = arith.constant 0 : index
    %c289 = arith.constant 289 : index
    %108 = vector.load %arg1[%c0_131, %c0_132, %c289] : memref<1x8x324xf32, #tpu.memory_space<vmem>>, vector<1x8x16xf32>
    %109 = vector.shape_cast %108 : vector<1x8x16xf32> to vector<8x16xf32>
    %c0_133 = arith.constant 0 : index
    %c256_134 = arith.constant 256 : index
    %110 = vector.load %arg5[%c0_133, %c256_134] : memref<8x288xf32, #tpu.memory_space<vmem>>, vector<8x16xf32>
    tpu.vector_store %arg5[%c0_133, %c256_134], %109 {strides = array<i32>} : memref<8x288xf32, #tpu.memory_space<vmem>>, vector<8x16xf32>,
    %c0_135 = arith.constant 0 : index
    %c0_136 = arith.constant 0 : index
    %c307 = arith.constant 307 : index
    %111 = vector.load %arg1[%c0_135, %c0_136, %c307] : memref<1x8x324xf32, #tpu.memory_space<vmem>>, vector<1x8x16xf32>
    %112 = vector.shape_cast %111 : vector<1x8x16xf32> to vector<8x16xf32>
    %c0_137 = arith.constant 0 : index
    %c272_138 = arith.constant 272 : index
    %113 = vector.load %arg5[%c0_137, %c272_138] : memref<8x288xf32, #tpu.memory_space<vmem>>, vector<8x16xf32>
    tpu.vector_store %arg5[%c0_137, %c272_138], %112 {strides = array<i32>} : memref<8x288xf32, #tpu.memory_space<vmem>>, vector<8x16xf32>,
    %c0_139 = arith.constant 0 : index
    %c0_140 = arith.constant 0 : index
    %114 = vector.load %arg5[%c0_139, %c0_140] : memref<8x288xf32, #tpu.memory_space<vmem>>, vector<8x256xf32>
    %c8 = arith.constant 8 : index
    %c0_141 = arith.constant 0 : index
    %115 = vector.load %arg6[%c8, %c0_141] : memref<72x256xf32, #tpu.memory_space<vmem>>, vector<8x256xf32>
    tpu.vector_store %arg6[%c8, %c0_141], %114 {strides = array<i32>} : memref<72x256xf32, #tpu.memory_space<vmem>>, vector<8x256xf32>,
    %c0_142 = arith.constant 0 : index
    %c16_143 = arith.constant 16 : index
    %116 = vector.load %arg5[%c0_142, %c16_143] : memref<8x288xf32, #tpu.memory_space<vmem>>, vector<8x256xf32>
    %c32_144 = arith.constant 32 : index
    %c0_145 = arith.constant 0 : index
    %117 = vector.load %arg6[%c32_144, %c0_145] : memref<72x256xf32, #tpu.memory_space<vmem>>, vector<8x256xf32>
    tpu.vector_store %arg6[%c32_144, %c0_145], %116 {strides = array<i32>} : memref<72x256xf32, #tpu.memory_space<vmem>>, vector<8x256xf32>,
    %c0_146 = arith.constant 0 : index
    %c32_147 = arith.constant 32 : index
    %118 = vector.load %arg5[%c0_146, %c32_147] : memref<8x288xf32, #tpu.memory_space<vmem>>, vector<8x256xf32>
    %c56 = arith.constant 56 : index
    %c0_148 = arith.constant 0 : index
    %119 = vector.load %arg6[%c56, %c0_148] : memref<72x256xf32, #tpu.memory_space<vmem>>, vector<8x256xf32>
    tpu.vector_store %arg6[%c56, %c0_148], %118 {strides = array<i32>} : memref<72x256xf32, #tpu.memory_space<vmem>>, vector<8x256xf32>,
    %c0_149 = arith.constant 0 : index
    %c0_150 = arith.constant 0 : index
    %c2 = arith.constant 2 : index
    %120 = vector.load %arg1[%c0_149, %c0_150, %c2] : memref<1x8x324xf32, #tpu.memory_space<vmem>>, vector<1x8x16xf32>
    %121 = vector.shape_cast %120 : vector<1x8x16xf32> to vector<8x16xf32>
    %c0_151 = arith.constant 0 : index
    %c0_152 = arith.constant 0 : index
    %122 = vector.load %arg5[%c0_151, %c0_152] : memref<8x288xf32, #tpu.memory_space<vmem>>, vector<8x16xf32>
    tpu.vector_store %arg5[%c0_151, %c0_152], %121 {strides = array<i32>} : memref<8x288xf32, #tpu.memory_space<vmem>>, vector<8x16xf32>,
    %c0_153 = arith.constant 0 : index
    %c0_154 = arith.constant 0 : index
    %c20 = arith.constant 20 : index
    %123 = vector.load %arg1[%c0_153, %c0_154, %c20] : memref<1x8x324xf32, #tpu.memory_space<vmem>>, vector<1x8x16xf32>
    %124 = vector.shape_cast %123 : vector<1x8x16xf32> to vector<8x16xf32>
    %c0_155 = arith.constant 0 : index
    %c16_156 = arith.constant 16 : index
    %125 = vector.load %arg5[%c0_155, %c16_156] : memref<8x288xf32, #tpu.memory_space<vmem>>, vector<8x16xf32>
    tpu.vector_store %arg5[%c0_155, %c16_156], %124 {strides = array<i32>} : memref<8x288xf32, #tpu.memory_space<vmem>>, vector<8x16xf32>,
    %c0_157 = arith.constant 0 : index
    %c0_158 = arith.constant 0 : index
    %c38 = arith.constant 38 : index
    %126 = vector.load %arg1[%c0_157, %c0_158, %c38] : memref<1x8x324xf32, #tpu.memory_space<vmem>>, vector<1x8x16xf32>
    %127 = vector.shape_cast %126 : vector<1x8x16xf32> to vector<8x16xf32>
    %c0_159 = arith.constant 0 : index
    %c32_160 = arith.constant 32 : index
    %128 = vector.load %arg5[%c0_159, %c32_160] : memref<8x288xf32, #tpu.memory_space<vmem>>, vector<8x16xf32>
    tpu.vector_store %arg5[%c0_159, %c32_160], %127 {strides = array<i32>} : memref<8x288xf32, #tpu.memory_space<vmem>>, vector<8x16xf32>,
    %c0_161 = arith.constant 0 : index
    %c0_162 = arith.constant 0 : index
    %c56_163 = arith.constant 56 : index
    %129 = vector.load %arg1[%c0_161, %c0_162, %c56_163] : memref<1x8x324xf32, #tpu.memory_space<vmem>>, vector<1x8x16xf32>
    %130 = vector.shape_cast %129 : vector<1x8x16xf32> to vector<8x16xf32>
    %c0_164 = arith.constant 0 : index
    %c48_165 = arith.constant 48 : index
    %131 = vector.load %arg5[%c0_164, %c48_165] : memref<8x288xf32, #tpu.memory_space<vmem>>, vector<8x16xf32>
    tpu.vector_store %arg5[%c0_164, %c48_165], %130 {strides = array<i32>} : memref<8x288xf32, #tpu.memory_space<vmem>>, vector<8x16xf32>,
    %c0_166 = arith.constant 0 : index
    %c0_167 = arith.constant 0 : index
    %c74 = arith.constant 74 : index
    %132 = vector.load %arg1[%c0_166, %c0_167, %c74] : memref<1x8x324xf32, #tpu.memory_space<vmem>>, vector<1x8x16xf32>
    %133 = vector.shape_cast %132 : vector<1x8x16xf32> to vector<8x16xf32>
    %c0_168 = arith.constant 0 : index
    %c64_169 = arith.constant 64 : index
    %134 = vector.load %arg5[%c0_168, %c64_169] : memref<8x288xf32, #tpu.memory_space<vmem>>, vector<8x16xf32>
    tpu.vector_store %arg5[%c0_168, %c64_169], %133 {strides = array<i32>} : memref<8x288xf32, #tpu.memory_space<vmem>>, vector<8x16xf32>,
    %c0_170 = arith.constant 0 : index
    %c0_171 = arith.constant 0 : index
    %c92 = arith.constant 92 : index
    %135 = vector.load %arg1[%c0_170, %c0_171, %c92] : memref<1x8x324xf32, #tpu.memory_space<vmem>>, vector<1x8x16xf32>
    %136 = vector.shape_cast %135 : vector<1x8x16xf32> to vector<8x16xf32>
    %c0_172 = arith.constant 0 : index
    %c80_173 = arith.constant 80 : index
    %137 = vector.load %arg5[%c0_172, %c80_173] : memref<8x288xf32, #tpu.memory_space<vmem>>, vector<8x16xf32>
    tpu.vector_store %arg5[%c0_172, %c80_173], %136 {strides = array<i32>} : memref<8x288xf32, #tpu.memory_space<vmem>>, vector<8x16xf32>,
    %c0_174 = arith.constant 0 : index
    %c0_175 = arith.constant 0 : index
    %c110 = arith.constant 110 : index
    %138 = vector.load %arg1[%c0_174, %c0_175, %c110] : memref<1x8x324xf32, #tpu.memory_space<vmem>>, vector<1x8x16xf32>
    %139 = vector.shape_cast %138 : vector<1x8x16xf32> to vector<8x16xf32>
    %c0_176 = arith.constant 0 : index
    %c96_177 = arith.constant 96 : index
    %140 = vector.load %arg5[%c0_176, %c96_177] : memref<8x288xf32, #tpu.memory_space<vmem>>, vector<8x16xf32>
    tpu.vector_store %arg5[%c0_176, %c96_177], %139 {strides = array<i32>} : memref<8x288xf32, #tpu.memory_space<vmem>>, vector<8x16xf32>,
    %c0_178 = arith.constant 0 : index
    %c0_179 = arith.constant 0 : index
    %c128_180 = arith.constant 128 : index
    %141 = vector.load %arg1[%c0_178, %c0_179, %c128_180] : memref<1x8x324xf32, #tpu.memory_space<vmem>>, vector<1x8x16xf32>
    %142 = vector.shape_cast %141 : vector<1x8x16xf32> to vector<8x16xf32>
    %c0_181 = arith.constant 0 : index
    %c112_182 = arith.constant 112 : index
    %143 = vector.load %arg5[%c0_181, %c112_182] : memref<8x288xf32, #tpu.memory_space<vmem>>, vector<8x16xf32>
    tpu.vector_store %arg5[%c0_181, %c112_182], %142 {strides = array<i32>} : memref<8x288xf32, #tpu.memory_space<vmem>>, vector<8x16xf32>,
    %c0_183 = arith.constant 0 : index
    %c0_184 = arith.constant 0 : index
    %c146 = arith.constant 146 : index
    %144 = vector.load %arg1[%c0_183, %c0_184, %c146] : memref<1x8x324xf32, #tpu.memory_space<vmem>>, vector<1x8x16xf32>
    %145 = vector.shape_cast %144 : vector<1x8x16xf32> to vector<8x16xf32>
    %c0_185 = arith.constant 0 : index
    %c128_186 = arith.constant 128 : index
    %146 = vector.load %arg5[%c0_185, %c128_186] : memref<8x288xf32, #tpu.memory_space<vmem>>, vector<8x16xf32>
    tpu.vector_store %arg5[%c0_185, %c128_186], %145 {strides = array<i32>} : memref<8x288xf32, #tpu.memory_space<vmem>>, vector<8x16xf32>,
    %c0_187 = arith.constant 0 : index
    %c0_188 = arith.constant 0 : index
    %c164 = arith.constant 164 : index
    %147 = vector.load %arg1[%c0_187, %c0_188, %c164] : memref<1x8x324xf32, #tpu.memory_space<vmem>>, vector<1x8x16xf32>
    %148 = vector.shape_cast %147 : vector<1x8x16xf32> to vector<8x16xf32>
    %c0_189 = arith.constant 0 : index
    %c144_190 = arith.constant 144 : index
    %149 = vector.load %arg5[%c0_189, %c144_190] : memref<8x288xf32, #tpu.memory_space<vmem>>, vector<8x16xf32>
    tpu.vector_store %arg5[%c0_189, %c144_190], %148 {strides = array<i32>} : memref<8x288xf32, #tpu.memory_space<vmem>>, vector<8x16xf32>,
    %c0_191 = arith.constant 0 : index
    %c0_192 = arith.constant 0 : index
    %c182 = arith.constant 182 : index
    %150 = vector.load %arg1[%c0_191, %c0_192, %c182] : memref<1x8x324xf32, #tpu.memory_space<vmem>>, vector<1x8x16xf32>
    %151 = vector.shape_cast %150 : vector<1x8x16xf32> to vector<8x16xf32>
    %c0_193 = arith.constant 0 : index
    %c160_194 = arith.constant 160 : index
    %152 = vector.load %arg5[%c0_193, %c160_194] : memref<8x288xf32, #tpu.memory_space<vmem>>, vector<8x16xf32>
    tpu.vector_store %arg5[%c0_193, %c160_194], %151 {strides = array<i32>} : memref<8x288xf32, #tpu.memory_space<vmem>>, vector<8x16xf32>,
    %c0_195 = arith.constant 0 : index
    %c0_196 = arith.constant 0 : index
    %c200 = arith.constant 200 : index
    %153 = vector.load %arg1[%c0_195, %c0_196, %c200] : memref<1x8x324xf32, #tpu.memory_space<vmem>>, vector<1x8x16xf32>
    %154 = vector.shape_cast %153 : vector<1x8x16xf32> to vector<8x16xf32>
    %c0_197 = arith.constant 0 : index
    %c176_198 = arith.constant 176 : index
    %155 = vector.load %arg5[%c0_197, %c176_198] : memref<8x288xf32, #tpu.memory_space<vmem>>, vector<8x16xf32>
    tpu.vector_store %arg5[%c0_197, %c176_198], %154 {strides = array<i32>} : memref<8x288xf32, #tpu.memory_space<vmem>>, vector<8x16xf32>,
    %c0_199 = arith.constant 0 : index
    %c0_200 = arith.constant 0 : index
    %c218 = arith.constant 218 : index
    %156 = vector.load %arg1[%c0_199, %c0_200, %c218] : memref<1x8x324xf32, #tpu.memory_space<vmem>>, vector<1x8x16xf32>
    %157 = vector.shape_cast %156 : vector<1x8x16xf32> to vector<8x16xf32>
    %c0_201 = arith.constant 0 : index
    %c192_202 = arith.constant 192 : index
    %158 = vector.load %arg5[%c0_201, %c192_202] : memref<8x288xf32, #tpu.memory_space<vmem>>, vector<8x16xf32>
    tpu.vector_store %arg5[%c0_201, %c192_202], %157 {strides = array<i32>} : memref<8x288xf32, #tpu.memory_space<vmem>>, vector<8x16xf32>,
    %c0_203 = arith.constant 0 : index
    %c0_204 = arith.constant 0 : index
    %c236 = arith.constant 236 : index
    %159 = vector.load %arg1[%c0_203, %c0_204, %c236] : memref<1x8x324xf32, #tpu.memory_space<vmem>>, vector<1x8x16xf32>
    %160 = vector.shape_cast %159 : vector<1x8x16xf32> to vector<8x16xf32>
    %c0_205 = arith.constant 0 : index
    %c208_206 = arith.constant 208 : index
    %161 = vector.load %arg5[%c0_205, %c208_206] : memref<8x288xf32, #tpu.memory_space<vmem>>, vector<8x16xf32>
    tpu.vector_store %arg5[%c0_205, %c208_206], %160 {strides = array<i32>} : memref<8x288xf32, #tpu.memory_space<vmem>>, vector<8x16xf32>,
    %c0_207 = arith.constant 0 : index
    %c0_208 = arith.constant 0 : index
    %c254 = arith.constant 254 : index
    %162 = vector.load %arg1[%c0_207, %c0_208, %c254] : memref<1x8x324xf32, #tpu.memory_space<vmem>>, vector<1x8x16xf32>
    %163 = vector.shape_cast %162 : vector<1x8x16xf32> to vector<8x16xf32>
    %c0_209 = arith.constant 0 : index
    %c224_210 = arith.constant 224 : index
    %164 = vector.load %arg5[%c0_209, %c224_210] : memref<8x288xf32, #tpu.memory_space<vmem>>, vector<8x16xf32>
    tpu.vector_store %arg5[%c0_209, %c224_210], %163 {strides = array<i32>} : memref<8x288xf32, #tpu.memory_space<vmem>>, vector<8x16xf32>,
    %c0_211 = arith.constant 0 : index
    %c0_212 = arith.constant 0 : index
    %c272_213 = arith.constant 272 : index
    %165 = vector.load %arg1[%c0_211, %c0_212, %c272_213] : memref<1x8x324xf32, #tpu.memory_space<vmem>>, vector<1x8x16xf32>
    %166 = vector.shape_cast %165 : vector<1x8x16xf32> to vector<8x16xf32>
    %c0_214 = arith.constant 0 : index
    %c240_215 = arith.constant 240 : index
    %167 = vector.load %arg5[%c0_214, %c240_215] : memref<8x288xf32, #tpu.memory_space<vmem>>, vector<8x16xf32>
    tpu.vector_store %arg5[%c0_214, %c240_215], %166 {strides = array<i32>} : memref<8x288xf32, #tpu.memory_space<vmem>>, vector<8x16xf32>,
    %c0_216 = arith.constant 0 : index
    %c0_217 = arith.constant 0 : index
    %c290 = arith.constant 290 : index
    %168 = vector.load %arg1[%c0_216, %c0_217, %c290] : memref<1x8x324xf32, #tpu.memory_space<vmem>>, vector<1x8x16xf32>
    %169 = vector.shape_cast %168 : vector<1x8x16xf32> to vector<8x16xf32>
    %c0_218 = arith.constant 0 : index
    %c256_219 = arith.constant 256 : index
    %170 = vector.load %arg5[%c0_218, %c256_219] : memref<8x288xf32, #tpu.memory_space<vmem>>, vector<8x16xf32>
    tpu.vector_store %arg5[%c0_218, %c256_219], %169 {strides = array<i32>} : memref<8x288xf32, #tpu.memory_space<vmem>>, vector<8x16xf32>,
    %c0_220 = arith.constant 0 : index
    %c0_221 = arith.constant 0 : index
    %c308 = arith.constant 308 : index
    %171 = vector.load %arg1[%c0_220, %c0_221, %c308] : memref<1x8x324xf32, #tpu.memory_space<vmem>>, vector<1x8x16xf32>
    %172 = vector.shape_cast %171 : vector<1x8x16xf32> to vector<8x16xf32>
    %c0_222 = arith.constant 0 : index
    %c272_223 = arith.constant 272 : index
    %173 = vector.load %arg5[%c0_222, %c272_223] : memref<8x288xf32, #tpu.memory_space<vmem>>, vector<8x16xf32>
    tpu.vector_store %arg5[%c0_222, %c272_223], %172 {strides = array<i32>} : memref<8x288xf32, #tpu.memory_space<vmem>>, vector<8x16xf32>,
    %c0_224 = arith.constant 0 : index
    %c0_225 = arith.constant 0 : index
    %174 = vector.load %arg5[%c0_224, %c0_225] : memref<8x288xf32, #tpu.memory_space<vmem>>, vector<8x256xf32>
    %c16_226 = arith.constant 16 : index
    %c0_227 = arith.constant 0 : index
    %175 = vector.load %arg6[%c16_226, %c0_227] : memref<72x256xf32, #tpu.memory_space<vmem>>, vector<8x256xf32>
    tpu.vector_store %arg6[%c16_226, %c0_227], %174 {strides = array<i32>} : memref<72x256xf32, #tpu.memory_space<vmem>>, vector<8x256xf32>,
    %c0_228 = arith.constant 0 : index
    %c16_229 = arith.constant 16 : index
    %176 = vector.load %arg5[%c0_228, %c16_229] : memref<8x288xf32, #tpu.memory_space<vmem>>, vector<8x256xf32>
    %c40 = arith.constant 40 : index
    %c0_230 = arith.constant 0 : index
    %177 = vector.load %arg6[%c40, %c0_230] : memref<72x256xf32, #tpu.memory_space<vmem>>, vector<8x256xf32>
    tpu.vector_store %arg6[%c40, %c0_230], %176 {strides = array<i32>} : memref<72x256xf32, #tpu.memory_space<vmem>>, vector<8x256xf32>,
    %c0_231 = arith.constant 0 : index
    %c32_232 = arith.constant 32 : index
    %178 = vector.load %arg5[%c0_231, %c32_232] : memref<8x288xf32, #tpu.memory_space<vmem>>, vector<8x256xf32>
    %c64_233 = arith.constant 64 : index
    %c0_234 = arith.constant 0 : index
    %179 = vector.load %arg6[%c64_233, %c0_234] : memref<72x256xf32, #tpu.memory_space<vmem>>, vector<8x256xf32>
    tpu.vector_store %arg6[%c64_233, %c0_234], %178 {strides = array<i32>} : memref<72x256xf32, #tpu.memory_space<vmem>>, vector<8x256xf32>,
    %c0_235 = arith.constant 0 : index
    %c0_236 = arith.constant 0 : index
    %180 = vector.load %arg2[%c0_235, %c0_236] : memref<8x72xf32, #tpu.memory_space<vmem>>, vector<8x72xf32>
    %c0_237 = arith.constant 0 : index
    %c0_238 = arith.constant 0 : index
    %181 = vector.load %arg6[%c0_237, %c0_238] : memref<72x256xf32, #tpu.memory_space<vmem>>, vector<72x256xf32>
    %cst = arith.constant dense<0.000000e+00> : vector<8x256xf32>
    %182 = tpu.matmul %180, %181, %cst {dimension_numbers = #tpu.dot_dimension_numbers<[1], [0], [0], [1], [0, 0, 1, 1], [], []>} : vector<8x72xf32>, vector<72x256xf32>, vector<8x256xf32> -> vector<8x256xf32>
    %c0_239 = arith.constant 0 : index
    %c0_240 = arith.constant 0 : index
    %183 = vector.load %arg3[%c0_239, %c0_240] : memref<8x1xf32, #tpu.memory_space<vmem>>, vector<8x1xf32>
    %184 = vector.broadcast %183 : vector<8x1xf32> to vector<8x256xf32>
    %185 = arith.addf %182, %184 : vector<8x256xf32>
    %cst_241 = arith.constant 0.000000e+00 : f32
    %186 = vector.broadcast %cst_241 : f32 to vector<8x256xf32>
    %187 = arith.maximumf %185, %186 : vector<8x256xf32>
    %c0_242 = arith.constant 0 : index
    %c0_243 = arith.constant 0 : index
    %c0_244 = arith.constant 0 : index
    %188 = vector.load %arg4[%c0_242, %c0_243, %c0_244] : memref<1x8x256xf32, #tpu.memory_space<vmem>>, vector<1x8x256xf32>
    %189 = vector.shape_cast %188 : vector<1x8x256xf32> to vector<8x256xf32>
    %190 = vector.shape_cast %187 : vector<8x256xf32> to vector<1x8x256xf32>
    tpu.vector_store %arg4[%c0_242, %c0_243, %c0_244], %190 {strides = array<i32>} : memref<1x8x256xf32, #tpu.memory_space<vmem>>, vector<1x8x256xf32>,
    return
  }
  func.func @transform_0(%arg0: i32) -> (i32, i32, i32) {
    %c0_i32 = arith.constant 0 : i32
    %c0_i32_0 = arith.constant 0 : i32
    %c0_i32_1 = arith.constant 0 : i32
    return %arg0, %c0_i32, %c0_i32_0 : i32, i32, i32
  }
  func.func @transform_1(%arg0: i32) -> (i32, i32) {
    %c0_i32 = arith.constant 0 : i32
    %c0_i32_0 = arith.constant 0 : i32
    %c0_i32_1 = arith.constant 0 : i32
    return %c0_i32, %c0_i32_0 : i32, i32
  }
  func.func @transform_2(%arg0: i32) -> (i32, i32) {
    %c0_i32 = arith.constant 0 : i32
    %c0_i32_0 = arith.constant 0 : i32
    %c0_i32_1 = arith.constant 0 : i32
    return %c0_i32, %c0_i32_0 : i32, i32
  }
  func.func @transform_3(%arg0: i32) -> (i32, i32, i32) {
    %c0_i32 = arith.constant 0 : i32
    %c0_i32_0 = arith.constant 0 : i32
    %c0_i32_1 = arith.constant 0 : i32
    return %arg0, %c0_i32, %c0_i32_0 : i32, i32, i32
  }
}

</mosaic_0001>

<bundles_post_ra>
// kernel: tpu_custom_call.1
= control target key start
LH: loop header
LB: loop body
LE: loop exit
PB: predicated region body
PF: predicated region fallthrough
CT: control target
= control target key end

     0   :  { %8 = vsyncpa [#allocation5], 0  ;;  %s1450_s0 = inlined_call_operand.hbm [shape: f32[2,8,324], index: 0, kind: input, shape index: {}]   ;;  %s1451_s1 = inlined_call_operand.vmem [shape: f32[8,72], index: 1, kind: input, shape index: {}]   ;;  %s1452_s2 = inlined_call_operand.vmem [shape: f32[8,1], index: 2, kind: input, shape index: {}]   ;;  %s1453_s3 = inlined_call_operand.hbm [shape: f32[2,8,256], index: 3, kind: output, shape index: {}]  }
   0x1   :  { %10 = vsyncpa [#allocation5 + $0x1], 0 }
   0x2   :  { %11 = vsyncpa [#allocation6], 0 }
   0x3   :  { %13 = vsyncpa [#allocation6 + $0x1], 0  ;;  %s1111_s12 = smov 0   ;;  %s1113_s13 = smov 0  }
   0x4   :  { %s1115_s14 = smov 0   ;;  %s1117_s15 = smov 0  }
   0x5 LB: > { %s1132_s16 = sadd.s32 4294967295, %s1049_s15   ;;  %s856_s17 = sadd.s32 4294967294, %s1049_s15   ;;  %s1049_s15 = sphi %s1117_s15, %s1486_s15   ;;  %s1045_s14 = sphi %s1115_s14, %s1485_s14   ;;  %s1041_s13 = sphi %s1113_s13, %s1484_s13   ;;  %s1037_s12 = sphi %s1111_s12, %s1483_s12  }
   0x6   : > { %s1136_s18 = sadd.s32 1, %s1049_s15   ;;  %s26_s19 = sadd.s32 1, %s1045_s14 }
   0x7   : > { %s23_s20 = ssub.s32 %s1049_s15, %s1136_s18  ;;  %p33_p0 = scmp.ne.s32.totalorder %s1045_s14, %s1041_s13 }
   0x8   : > { %p24_p1 = scmp.eq.s32.totalorder %s23_s20, 0  ;;  %p34_p2 = scmp.eq.s32.totalorder %s1049_s15, 0 }
   0x9   : > { %p39_p3 = scmp.ne.s32.totalorder %s1041_s13, %s1037_s12  ;;  %p40_p4 = scmp.eq.s32.totalorder %s1132_s16, 0 }
   0xa   : > { %s1148_s21 = scalar_select %p24_p1, %s1045_s14, %s26_s19  }
   0xb   : > { %p35_p5 = por %p34_p2, %p33_p0  ;;  %p1150_p6 = por %p40_p4, %p39_p3 }
   0xc   : > { %p105_p7 = scmp.eq.s32.totalorder %s1132_s16, 1  ;;  %p111_p8 = scmp.eq.s32.totalorder %s856_s17, 1 }
   0xd   : > { %s1466_s22 = scalar_select %p1150_p6, 1, 0 }
   0xe   : > { %p884_p10 = scmp.lt.s32.totalorder %s1049_s15, 2  ;;  %p1157_p11 = por %p105_p7, %p33_p0 }
   0xf   : > { %p1161_p12 = por %p111_p8, %p39_p3  ;;  %s137_s25 = sand.u32 1, %s1045_s14  }
  0x10   : > { %s1467_s23 = scalar_select %p1157_p11, 1, 0 }
  0x11   : > { %s1468_s24 = scalar_select %p1161_p12, 1, 0 }
  0x12   : > { %s870_s26 = smul.u32 384, %s1049_s15  ;;  %p1172_p13 = pnand %p884_p10, %p35_p5 }
  0x13   : > { %s869_s27 = smul.u32 24, %s137_s25  ;;  %s138_s7 = scalar_lea.sflag [#allocation5], %s137_s25 }
  0x14   : > { %s1170_s30 = scalar_lea.hbm %s1450_s0, %s870_s26  ;;  %p959_p3 = pneg %p1172_p13 }
  0x15   : > { %s141_s5 = scalar_lea.vmem [#allocation4], %s869_s27  ;;  %s957_s8 = scalar_lea.hbm %s1170_s30, 384 }
  0x16   : > { %s149_s6 = sshll.u32 %s141_s5, 4  ;;  %p958_p2 = scmp.ne.s32.totalorder %s1170_s30, %s957_s8  ;;  %s150_s6 = int_to_ptr.vmem [resolvable:$true] %s149_s6 }
  0x17   : > { %s962_s11 = scalar_lea.hbm %s1450_s0, 768  ;;  %p963_p5 = scmp.lt.s32.totalorder %s1170_s30, %s1450_s0 }
  0x18   : > { %p960_p4 = pnand %p959_p3, %p958_p2  ;;  %p964_p8 = scmp.lt.s32.totalorder %s962_s11, %s957_s8 }
  0x1a   : > { %p961_p7 = pneg %p960_p4  ;;  %p965_p10 = por %p964_p8, %p963_p5 }
  0x1c   : > { %p966_p9 = pnand %p965_p10, %p961_p7 }
  0x1e   : > { %969 = shalt.err (!%p966_p9)
}
  0x1f   : > { %s970_s20 = scalar_lea.vmem %s150_s6, 384  ;;  %s1051_s25 = smov [#allocation4]  }
  0x20   : > { %p971_p0 = scmp.ne.s32.totalorder %s150_s6, %s970_s20  ;;  %s975_s26 = sshll.u32 %s1051_s25, 4  ;;  %s976_s26 = int_to_ptr.vmem [resolvable:$false] %s975_s26 }
  0x21   : > { %s977_s27 = scalar_lea.vmem %s976_s26, 768  ;;  %p978_p2 = scmp.lt.s32.totalorder %s150_s6, %s976_s26 }
  0x22   : > { %p973_p1 = pnand %p971_p0, %p959_p3  ;;  %p979_p4 = scmp.lt.s32.totalorder %s977_s27, %s970_s20 }
  0x24   : > { %p974_p12 = pneg %p973_p1  ;;  %p980_p11 = por %p979_p4, %p978_p2 }
  0x26   : > { %p981_p6 = pnand %p980_p11, %p974_p12 }
  0x28   : > { %984 = shalt.err (!%p981_p6)
}
  0x29   : > { %879 = dma.hbm_to_vmem [thread:$0]  (!%p1172_p13), %s1170_s30, 384, %s150_s6, %s138_s7  }
  0x2a   : > { %p1470_p9 = scmp.lt.s32.totalorder %s1049_s15, 3  ;;  %p1471_p7 = scmp.ge.s32.totalorder %s1049_s15, 1 }
  0x2c   : > { %p155_p5 = pnand %p1471_p7, %p1470_p9 }
  0x2d   : > { %s1197_s28 = sand.u32 (!%p155_p5), 1, %s1041_s13   ;;  %p1472_p6 = scmp.ne.s32.totalorder (!%p155_p5), %s1466_s22, 0 }
  0x2e   : > { %158 = sbr.rel (%p155_p5) target bundleno = 651 (0x28b), region = 32  ;;  %s161_s5 = scalar_lea.sflag (!%p155_p5), [#allocation5], %s1197_s28 }
  0x2f   : > { %s871_s29 = smul.u32 (!%p155_p5), 24, %s1197_s28 }
  0x31   : > { %s164_s8 = scalar_lea.vmem (!%p155_p5), [#allocation4], %s871_s29 }
  0x33   : > { %1028 = dma.done.wait (%p1472_p6), %s161_s5, 384  }
  0x34   : > { %1030 = vsyncadd (%p1472_p6), %s161_s5, 4294966912  ;;  %v1205_v0 = vld [vmem:[%s164_s8 + $0x8] sm:$0xff]  ;;  %v1207_v1 = vld [vmem:[%s164_s8] sm:$0xff]  ;;  %vm188_vm0 = vcmask 130048   ;;  %s1456_s30 = smov 112   ;;  %s1053_s4 = smov 126  }
  0x35   : > { %247 = vrot.lane.b32.xlu0 %v1205_v0, %s1456_s30  ;;  %192 = vrot.lane.b32.xlu1 %v1207_v1, %s1053_s4  ;;  %189 = vst.msk [vmem:[#allocation2] sm:$0xff] %vm188_vm0, %v1207_v1  ;;  %s1054_s6 = smov 110   ;;  %s1055_s22 = smov 108   ;;  %v1231_v2 = vld [vmem:[%s164_s8 + $0x10] sm:$0xff]  ;;  %vm195_vm1 = vcmask 261248   ;;  %vm202_vm2 = vcmask 392448  }
  0x36   : > { %s1056_s7 = smov 124   ;;  %s1057_s9 = smov 106   ;;  %vm209_vm3 = vcmask 523648   ;;  %vm216_vm4 = vcmask 654848   ;;  %vm223_vm5 = vcmask 786048   ;;  %vm289_vm6 = vcmask 818176  }
  0x37   : > { %s1058_s10 = smov 122   ;;  %s1059_s11 = smov 104   ;;  %vm230_vm7 = vcmask 917248   ;;  %vm240_vm8 = vcmask 932864   ;;  %vm243_vm9 = vcmask 1048448   ;;  %vm451_vm10 = vcmask 809984  }
  0x38   : > { %s1060_s17 = smov 120   ;;  %s1061_s19 = smov 102   ;;  %vm403_vm11 = vcmask 924672   ;;  %vm605_vm12 = vcmask 801792   ;;  %vm346_vm13 = vcmask 785408   ;;  %vm327_vm14 = vcmask 916480  }
  0x39   : > { %253 = vrot.lane.b32.xlu0 %v1205_v0, %s1054_s6  ;;  %259 = vrot.lane.b32.xlu1 %v1205_v0, %s1055_s22  ;;  %s1459_s20 = smov 100   ;;  %s1063_s25 = smov 118   ;;  %vm692_vm15 = vcmask 588800  }
  0x3a   : > { %s1458_s26 = smov 116   ;;  %s1460_s27 = smov 114  }
  0x3b   : > { %s1461_s29 = smov 98   ;;  %s1067_s5 = smov 111  }
  0x3c   : > { %s1068_s8 = smov 127   ;;  %s1069_s30 = smov 109  }
  0x3d   : > { %199 = vrot.lane.b32.xlu0 %v1207_v1, %s1056_s7  ;;  %265 = vrot.lane.b32.xlu1 %v1205_v0, %s1057_s9  ;;  %p1480_p12 = scmp.ne.s32.totalorder %s1467_s23, 0 }
  0x41   : > { %206 = vrot.lane.b32.xlu0 %v1207_v1, %s1058_s10  ;;  %271 = vrot.lane.b32.xlu1 %v1205_v0, %s1059_s11 }
  0x45   : > { %213 = vrot.lane.b32.xlu0 %v1207_v1, %s1060_s17  ;;  %277 = vrot.lane.b32.xlu1 %v1205_v0, %s1061_s19 }
  0x49   : > { %285 = vrot.lane.b32.xlu0 %v1205_v0, %s1459_s20  ;;  %287 = vrot.lane.b32.xlu1 %v1231_v2, %s1459_s20  ;;  %s1071_s20 = smov 107  }
  0x4d   : > { %220 = vrot.lane.b32.xlu0 %v1207_v1, %s1063_s25  ;;  %227 = vrot.lane.b32.xlu1 %v1207_v1, %s1458_s26  ;;  %s1070_s26 = smov 125  }
  0x51   : > { %236 = vrot.lane.b32.xlu0 %v1207_v1, %s1460_s27  ;;  %238 = vrot.lane.b32.xlu1 %v1205_v0, %s1460_s27  ;;  %s1463_s27 = smov 96  }
  0x55   : > { %295 = vrot.lane.b32.xlu0 %v1231_v2, %s1461_s29  ;;  %409 = vrot.lane.b32.xlu1 %v1205_v0, %s1067_s5  ;;  %s1073_s29 = smov 123   ;;  %s1074_s5 = smov 105  }
  0x59   : > { %355 = vrot.lane.b32.xlu0 %v1207_v1, %s1068_s8  ;;  %415 = vrot.lane.b32.xlu1 %v1205_v0, %s1069_s30  ;;  %s1465_s8 = smov 94   ;;  %s1076_s30 = smov 121  }
  0x5d   : > { %361 = vrot.lane.b32.xlu0 %v1207_v1, %s1070_s26  ;;  %421 = vrot.lane.b32.xlu1 %v1205_v0, %s1071_s20  ;;  %s1077_s26 = smov 103   ;;  %s1078_s20 = smov 119  }
  0x61   : > { %301 = vrot.lane.b32.xlu0 %v1231_v2, %s1463_s27  ;;  %367 = vrot.lane.b32.xlu1 %v1207_v1, %s1073_s29  ;;  %s1079_s27 = smov 101   ;;  %s1080_s29 = smov 99  }
  0x65   : > { %427 = vrot.lane.b32.xlu0 %v1205_v0, %s1074_s5  ;;  %307 = vrot.lane.b32.xlu1 %v1231_v2, %s1465_s8  ;;  %s1081_s5 = smov 117   ;;  %s1082_s8 = smov 115  }
  0x69   : > { %373 = vrot.lane.b32.xlu0 %v1207_v1, %s1076_s30  ;;  %433 = vrot.lane.b32.xlu1 %v1205_v0, %s1077_s26  ;;  %s1083_s30 = smov 113   ;;  %s1084_s26 = smov 97  }
  0x6d   : > { %379 = vrot.lane.b32.xlu0 %v1207_v1, %s1078_s20  ;;  %439 = vrot.lane.b32.xlu1 %v1205_v0, %s1079_s27  ;;  %s1085_s27 = smov 95   ;;  %s1086_s20 = smov 93  }
  0x71   : > { %447 = vrot.lane.b32.xlu0 %v1205_v0, %s1080_s29  ;;  %449 = vrot.lane.b32.xlu1 %v1231_v2, %s1080_s29 }
  0x75   : > { %385 = vrot.lane.b32.xlu0 %v1207_v1, %s1081_s5  ;;  %391 = vrot.lane.b32.xlu1 %v1207_v1, %s1082_s8  ;;  %s861_s5 = sshll.u32 %s1197_s28, 4 }
  0x79   : > { %399 = vrot.lane.b32.xlu0 %v1207_v1, %s1083_s30  ;;  %401 = vrot.lane.b32.xlu1 %v1205_v0, %s1083_s30  ;;  %s868_s30 = sshll.u32 %s1132_s16, 8 }
  0x7d   : > { %457 = vrot.lane.b32.xlu0 %v1231_v2, %s1084_s26  ;;  %463 = vrot.lane.b32.xlu1 %v1231_v2, %s1085_s27  ;;  %s186_s26 = scalar_lea.vmem [#allocation7], %s861_s5 }
  0x7e   : > { %s786_s27 = sshll.u32 %s186_s26, 4  ;;  %s787_s27 = int_to_ptr.vmem [resolvable:$true] %s786_s27 }
  0x81   : > { %469 = vrot.lane.b32.xlu0 %v1231_v2, %s1086_s20  ;;  %563 = vrot.lane.b32.xlu1 %v1205_v0, %s1054_s6  ;;  %s1474_s6 = smov 98  }
  0x85   : > { %515 = vrot.lane.b32.xlu0 %v1207_v1, %s1053_s4  ;;  %569 = vrot.lane.b32.xlu1 %v1205_v0, %s1055_s22  ;;  %s1473_s4 = smov 100   ;;  %s1475_s22 = smov 116  }
  0x89   : > { %521 = vrot.lane.b32.xlu0 %v1207_v1, %s1056_s7  ;;  %575 = vrot.lane.b32.xlu1 %v1205_v0, %s1057_s9  ;;  %s1476_s7 = smov 94   ;;  %s1477_s9 = smov 114  }
  0x8d   : > { %527 = vrot.lane.b32.xlu0 %v1207_v1, %s1058_s10  ;;  %581 = vrot.lane.b32.xlu1 %v1205_v0, %s1059_s11  ;;  %s1478_s10 = smov 96   ;;  %s1087_s11 = smov 92  }
  0x91   : > { %533 = vrot.lane.b32.xlu0 %v1207_v1, %s1060_s17  ;;  %587 = vrot.lane.b32.xlu1 %v1205_v0, %s1061_s19  ;;  %s1479_s17 = smov 112  }
  0x95   : > { %539 = vrot.lane.b32.xlu0 %v1207_v1, %s1063_s25  ;;  %593 = vrot.lane.b32.xlu1 %v1205_v0, %s1473_s4 }
  0x99   : > { %601 = vrot.lane.b32.xlu0 %v1205_v0, %s1474_s6  ;;  %603 = vrot.lane.b32.xlu1 %v1231_v2, %s1474_s6  ;;  %s784_s6 = scalar_lea.hbm %s1453_s3, %s868_s30 }
  0x9d   : > { %545 = vrot.lane.b32.xlu0 %v1207_v1, %s1475_s22  ;;  %617 = vrot.lane.b32.xlu1 %v1231_v2, %s1476_s7  ;;  %s772_s22 = scalar_lea.sflag [#allocation6], %s1197_s28  ;;  %s985_s7 = scalar_lea.vmem %s787_s27, 256 }
  0x9e   : > { %p986_p11 = scmp.ne.s32.totalorder %s787_s27, %s985_s7 }
  0xa0   : > { %p987_p13 = pnand %p986_p11, %p1480_p12 }
  0xa1   : > { %551 = vrot.lane.b32.xlu0 %v1207_v1, %s1477_s9  ;;  %611 = vrot.lane.b32.xlu1 %v1231_v2, %s1478_s10  ;;  %s1090_s9 = smov [#allocation7]  }
  0xa2   : > { %p988_p0 = pneg %p987_p13  ;;  %s989_s16 = sshll.u32 %s1090_s9, 4  ;;  %s990_s16 = int_to_ptr.vmem [resolvable:$false] %s989_s16 }
  0xa3   : > { %p992_p1 = scmp.lt.s32.totalorder %s787_s27, %s990_s16 }
  0xa5   : > { %623 = vrot.lane.b32.xlu0 %v1231_v2, %s1087_s11  ;;  %557 = vrot.lane.b32.xlu1 %v1205_v0, %s1479_s17 }
  0xa7   : > { %v248_v3 = vpop.permute.xlu0 %247  ;;  %v193_v4 = vpop.permute.xlu1 %192 }
  0xa8   : > { %250 = vst.msk [vmem:[#allocation2 + $0x8] sm:$0xff] %vm188_vm0, %v248_v3 }
  0xa9   : > { %196 = vst.msk [vmem:[#allocation2] sm:$0xff] %vm195_vm1, %v193_v4 }
  0xab   : > { %v254_v5 = vpop.permute.xlu0 %253  ;;  %v260_v6 = vpop.permute.xlu1 %259 }
  0xac   : > { %256 = vst.msk [vmem:[#allocation2 + $0x8] sm:$0xff] %vm195_vm1, %v254_v5 }
  0xad   : > { %262 = vst.msk [vmem:[#allocation2 + $0x8] sm:$0xff] %vm202_vm2, %v260_v6 }
  0xaf   : > { %v200_v7 = vpop.permute.xlu0 %199  ;;  %v266_v8 = vpop.permute.xlu1 %265 }
  0xb0   : > { %203 = vst.msk [vmem:[#allocation2] sm:$0xff] %vm202_vm2, %v200_v7 }
  0xb1   : > { %268 = vst.msk [vmem:[#allocation2 + $0x8] sm:$0xff] %vm209_vm3, %v266_v8 }
  0xb3   : > { %v207_v9 = vpop.permute.xlu0 %206  ;;  %v272_v10 = vpop.permute.xlu1 %271 }
  0xb4   : > { %210 = vst.msk [vmem:[#allocation2] sm:$0xff] %vm209_vm3, %v207_v9 }
  0xb5   : > { %274 = vst.msk [vmem:[#allocation2 + $0x8] sm:$0xff] %vm216_vm4, %v272_v10 }
  0xb7   : > { %v214_v11 = vpop.permute.xlu0 %213  ;;  %v278_v12 = vpop.permute.xlu1 %277 }
  0xb8   : > { %217 = vst.msk [vmem:[#allocation2] sm:$0xff] %vm216_vm4, %v214_v11  ;;  %v1088_v11 = vmov 0.0  }
  0xb9   : > { %280 = vst.msk [vmem:[#allocation2 + $0x8] sm:$0xff] %vm223_vm5, %v278_v12  ;;  %760 = vmatprep.mubr.f32.mxu0 %v1088_v11  ;;  %v686_v12 = vld [vmem:[%s1452_s2] sm:$0xff] }
  0xbb   : > { %v286_v13 = vpop.permute.xlu0 %285  ;;  %v288_v14 = vpop.permute.xlu1 %287 }
  0xbc   : > { %v290_v15 = vsel %vm289_vm6, %v286_v13, %v288_v14  ;;  %v1089_v13 = vmov 0  }
  0xbd   : > { %292 = vst.msk [vmem:[#allocation2 + $0x8] sm:$0xff] %vm230_vm7, %v290_v15  ;;  %956 = vset.pattern.permute.xlu0 %v1089_v13 }
  0xbf   : > { %v221_v16 = vpop.permute.xlu0 %220  ;;  %v228_v17 = vpop.permute.xlu1 %227 }
  0xc0   : > { %224 = vst.msk [vmem:[#allocation2] sm:$0xff] %vm223_vm5, %v221_v16 }
  0xc1   : > { %231 = vst.msk [vmem:[#allocation2] sm:$0xff] %vm230_vm7, %v228_v17 }
  0xc3   : > { %v237_v18 = vpop.permute.xlu0 %236  ;;  %v239_v19 = vpop.permute.xlu1 %238 }
  0xc4   : > { %v241_v20 = vsel %vm240_vm8, %v237_v18, %v239_v19 }
  0xc5   : > { %244 = vst.msk [vmem:[#allocation2] sm:$0xff] %vm243_vm9, %v241_v20 }
  0xc7   : > { %v296_v21 = vpop.permute.xlu0 %295  ;;  %v410_v22 = vpop.permute.xlu1 %409 }
  0xc8   : > { %298 = vst.msk [vmem:[#allocation2 + $0x8] sm:$0xff] %vm243_vm9, %v296_v21 }
  0xcb   : > { %v356_v23 = vpop.permute.xlu0 %355  ;;  %v416_v24 = vpop.permute.xlu1 %415 }
  0xcc   : > { %v1323_v25 = vld [vmem:[#allocation2] sm:$0xff] }
  0xcd   : > { %340 = vrot.lane.b32.xlu0 %v1323_v25, %s1478_s10  ;;  %358 = vst.msk [vmem:[#allocation2] sm:$0xff] %vm188_vm0, %v356_v23 }
  0xcf   : > { %v362_v26 = vpop.permute.xlu0 %361  ;;  %v422_v27 = vpop.permute.xlu1 %421  ;;  %v1328_v28 = vld [vmem:[#allocation2 + $0x8] sm:$0xff] }
  0xd0   : > { %364 = vst.msk [vmem:[#allocation2] sm:$0xff] %vm195_vm1, %v362_v26 }
  0xd1   : > { %412 = vst.msk [vmem:[#allocation2 + $0x8] sm:$0xff] %vm188_vm0, %v410_v22  ;;  %342 = vrot.lane.b32.xlu0 %v1328_v28, %s1478_s10 }
  0xd2   : > { %418 = vst.msk [vmem:[#allocation2 + $0x8] sm:$0xff] %vm195_vm1, %v416_v24 }
  0xd3   : > { %424 = vst.msk [vmem:[#allocation2 + $0x8] sm:$0xff] %vm202_vm2, %v422_v27  ;;  %v302_v29 = vpop.permute.xlu0 %301  ;;  %v368_v30 = vpop.permute.xlu1 %367 }
  0xd4   : > { %304 = vst.msk [vmem:[#allocation2 + $0x10] sm:$0xff] %vm188_vm0, %v302_v29 }
  0xd5   : > { %370 = vst.msk [vmem:[#allocation2] sm:$0xff] %vm202_vm2, %v368_v30 }
  0xd7   : > { %v428_v31 = vpop.permute.xlu0 %427  ;;  %v308_v32 = vpop.permute.xlu1 %307 }
  0xd8   : > { %430 = vst.msk [vmem:[#allocation2 + $0x8] sm:$0xff] %vm209_vm3, %v428_v31 }
  0xd9   : > { %310 = vst.msk [vmem:[#allocation2 + $0x10] sm:$0xff] %vm195_vm1, %v308_v32 }
  0xdb   : > { %v374_v33 = vpop.permute.xlu0 %373  ;;  %v434_v34 = vpop.permute.xlu1 %433 }
  0xdc   : > { %376 = vst.msk [vmem:[#allocation2] sm:$0xff] %vm209_vm3, %v374_v33 }
  0xdd   : > { %436 = vst.msk [vmem:[#allocation2 + $0x8] sm:$0xff] %vm216_vm4, %v434_v34 }
  0xdf   : > { %v380_v35 = vpop.permute.xlu0 %379  ;;  %v440_v36 = vpop.permute.xlu1 %439 }
  0xe0   : > { %v1342_v37 = vld [vmem:[#allocation2 + $0x10] sm:$0xff]  ;;  %382 = vst.msk [vmem:[#allocation2] sm:$0xff] %vm216_vm4, %v380_v35 }
  0xe1   : > { %442 = vst.msk [vmem:[#allocation2 + $0x8] sm:$0xff] %vm223_vm5, %v440_v36  ;;  %344 = vrot.lane.b32.xlu1 %v1342_v37, %s1478_s10 }
  0xe3   : > { %v448_v38 = vpop.permute.xlu0 %447  ;;  %v450_v39 = vpop.permute.xlu1 %449 }
  0xe4   : > { %v452_v40 = vsel %vm451_vm10, %v448_v38, %v450_v39 }
  0xe5   : > { %454 = vst.msk [vmem:[#allocation2 + $0x8] sm:$0xff] %vm230_vm7, %v452_v40 }
  0xe7   : > { %v386_v41 = vpop.permute.xlu0 %385  ;;  %v392_v42 = vpop.permute.xlu1 %391 }
  0xe8   : > { %388 = vst.msk [vmem:[#allocation2] sm:$0xff] %vm223_vm5, %v386_v41 }
  0xe9   : > { %394 = vst.msk [vmem:[#allocation2] sm:$0xff] %vm230_vm7, %v392_v42 }
  0xeb   : > { %v400_v43 = vpop.permute.xlu0 %399  ;;  %v402_v44 = vpop.permute.xlu1 %401 }
  0xec   : > { %v404_v45 = vsel %vm403_vm11, %v400_v43, %v402_v44 }
  0xed   : > { %406 = vst.msk [vmem:[#allocation2] sm:$0xff] %vm243_vm9, %v404_v45 }
  0xef   : > { %v458_v46 = vpop.permute.xlu0 %457  ;;  %v464_v47 = vpop.permute.xlu1 %463 }
  0xf0   : > { %460 = vst.msk [vmem:[#allocation2 + $0x8] sm:$0xff] %vm243_vm9, %v458_v46  ;;  %v667_v46 = vld [vmem:[%s1451_s1] sm:$0xff] }
  0xf1   : > { %466 = vst.msk [vmem:[#allocation2 + $0x10] sm:$0xff] %vm188_vm0, %v464_v47 }
  0xf3   : > { %v470_v48 = vpop.permute.xlu0 %469  ;;  %v564_v49 = vpop.permute.xlu1 %563 }
  0xf4   : > { %472 = vst.msk [vmem:[#allocation2 + $0x10] sm:$0xff] %vm195_vm1, %v470_v48  ;;  %v1355_v52 = vld [vmem:[#allocation2] sm:$0xff] }
  0xf7   : > { %v516_v50 = vpop.permute.xlu0 %515  ;;  %v570_v51 = vpop.permute.xlu1 %569  ;;  %v1357_v53 = vld [vmem:[#allocation2 + $0x8] sm:$0xff] }
  0xf8   : > { %518 = vst.msk [vmem:[#allocation2] sm:$0xff] %vm188_vm0, %v516_v50  ;;  %566 = vst.msk [vmem:[#allocation2 + $0x8] sm:$0xff] %vm188_vm0, %v564_v49 }
  0xf9   : > { %572 = vst.msk [vmem:[#allocation2 + $0x8] sm:$0xff] %vm195_vm1, %v570_v51 }
  0xfb   : > { %v522_v54 = vpop.permute.xlu0 %521  ;;  %v576_v55 = vpop.permute.xlu1 %575  ;;  %v497_v56 = vld [vmem:[#allocation2 + $0x10] sm:$0xff] }
  0xfc   : > { %505 = vrot.lane.b32.xlu0 %v497_v56, %s1478_s10  ;;  %524 = vst.msk [vmem:[#allocation2] sm:$0xff] %vm195_vm1, %v522_v54 }
  0xfd   : > { %578 = vst.msk [vmem:[#allocation2 + $0x8] sm:$0xff] %vm202_vm2, %v576_v55 }
  0xff   : > { %v528_v57 = vpop.permute.xlu0 %527  ;;  %v582_v58 = vpop.permute.xlu1 %581 }
 0x100   : > { %530 = vst.msk [vmem:[#allocation2] sm:$0xff] %vm202_vm2, %v528_v57 }
 0x101   : > { %584 = vst.msk [vmem:[#allocation2 + $0x8] sm:$0xff] %vm209_vm3, %v582_v58 }
 0x103   : > { %v534_v59 = vpop.permute.xlu0 %533  ;;  %v588_v60 = vpop.permute.xlu1 %587 }
 0x104   : > { %536 = vst.msk [vmem:[#allocation2] sm:$0xff] %vm209_vm3, %v534_v59 }
 0x105   : > { %590 = vst.msk [vmem:[#allocation2 + $0x8] sm:$0xff] %vm216_vm4, %v588_v60 }
 0x107   : > { %v540_v61 = vpop.permute.xlu0 %539  ;;  %v594_v62 = vpop.permute.xlu1 %593 }
 0x108   : > { %542 = vst.msk [vmem:[#allocation2] sm:$0xff] %vm216_vm4, %v540_v61 }
 0x109   : > { %596 = vst.msk [vmem:[#allocation2 + $0x8] sm:$0xff] %vm223_vm5, %v594_v62 }
 0x10b   : > { %v602_v63 = vpop.permute.xlu0 %601  ;;  %v604_v0 = vpop.permute.xlu1 %603 }
 0x10c   : > { %v606_v1 = vsel %vm605_vm12, %v602_v63, %v604_v0 }
 0x10d   : > { %608 = vst.msk [vmem:[#allocation2 + $0x8] sm:$0xff] %vm230_vm7, %v606_v1 }
 0x10f   : > { %v546_v2 = vpop.permute.xlu0 %545  ;;  %v618_v3 = vpop.permute.xlu1 %617 }
 0x110   : > { %620 = vst.msk [vmem:[#allocation2 + $0x10] sm:$0xff] %vm188_vm0, %v618_v3 }
 0x111   : > { %548 = vst.msk [vmem:[#allocation2] sm:$0xff] %vm223_vm5, %v546_v2 }
 0x113   : > { %v552_v4 = vpop.permute.xlu0 %551  ;;  %v612_v5 = vpop.permute.xlu1 %611 }
 0x114   : > { %554 = vst.msk [vmem:[#allocation2] sm:$0xff] %vm230_vm7, %v552_v4 }
 0x115   : > { %614 = vst.msk [vmem:[#allocation2 + $0x8] sm:$0xff] %vm243_vm9, %v612_v5 }
 0x117   : > { %v624_v6 = vpop.permute.xlu0 %623  ;;  %v558_v7 = vpop.permute.xlu1 %557 }
 0x118   : > { %626 = vst.msk [vmem:[#allocation2 + $0x10] sm:$0xff] %vm195_vm1, %v624_v6 }
 0x119   : > { %560 = vst.msk [vmem:[#allocation2] sm:$0xff] %vm243_vm9, %v558_v7 }
 0x11c   : > { %v650_v10 = vld [vmem:[#allocation2 + $0x8] sm:$0xff] }
 0x11f   : > { %v651_v8 = vld [vmem:[#allocation2 + $0x10] sm:$0xff] }
 0x120   : > { %659 = vrot.lane.b32.xlu1 %v651_v8, %s1478_s10  ;;  %641 = vrot.lane.b32.xlu0 %v651_v8, %s1479_s17  ;;  %v1380_v9 = vld [vmem:[#allocation2] sm:$0xff] }
 0x124   : > { %501 = vrot.lane.b32.xlu1 %v1355_v52, %s1478_s10  ;;  %655 = vrot.lane.b32.xlu0 %v1380_v9, %s1478_s10 }
 0x128   : > { %503 = vrot.lane.b32.xlu1 %v1357_v53, %s1478_s10  ;;  %657 = vrot.lane.b32.xlu0 %v650_v10, %s1478_s10  ;;  %s991_s10 = scalar_lea.vmem %s990_s16, 512 }
 0x129   : > { %p993_p3 = scmp.lt.s32.totalorder %s991_s10, %s985_s7 }
 0x12b   : > { %p994_p8 = por %p993_p3, %p992_p1 }
 0x12c   : > { %485 = vrot.lane.b32.xlu0 %v1357_v53, %s1479_s17  ;;  %637 = vrot.lane.b32.xlu1 %v1380_v9, %s1479_s17 }
 0x12d   : > { %p995_p10 = pnand %p994_p8, %p988_p0 }
 0x130   : > { %483 = vrot.lane.b32.xlu0 %v1355_v52, %s1479_s17  ;;  %487 = vrot.lane.b32.xlu1 %v497_v56, %s1479_s17 }
 0x134   : > { %325 = vrot.lane.b32.xlu0 %v1342_v37, %s1479_s17  ;;  %639 = vrot.lane.b32.xlu1 %v650_v10, %s1479_s17 }
 0x138   : > { %323 = vrot.lane.b32.xlu1 %v1328_v28, %s1479_s17  ;;  %689 = vperm.xlu0 %956, %v686_v12  }
 0x13c   : > { %321 = vrot.lane.b32.xlu1 %v1323_v25, %s1479_s17 }
 0x13f   : > { %v341_v14 = vpop.permute.xlu0 %340 }
 0x143   : > { %v343_v15 = vpop.permute.xlu0 %342 }
 0x144   : > { %v347_v33 = vsel %vm346_vm13, %v341_v14, %v343_v15 }
 0x153   : > { %v345_v16 = vpop.permute.xlu1 %344 }
 0x154   : > { %v348_v32 = vsel %vm346_vm13, %v343_v15, %v345_v16 }
 0x16e   : > { %v506_v17 = vpop.permute.xlu0 %505 }
 0x192   : > { %v660_v18 = vpop.permute.xlu1 %659  ;;  %v642_v19 = vpop.permute.xlu0 %641 }
 0x196   : > { %v502_v20 = vpop.permute.xlu1 %501  ;;  %v656_v21 = vpop.permute.xlu0 %655 }
 0x19a   : > { %v504_v22 = vpop.permute.xlu1 %503  ;;  %v658_v23 = vpop.permute.xlu0 %657 }
 0x19b   : > { %v662_v24 = vsel %vm346_vm13, %v658_v23, %v660_v18  ;;  %v661_v26 = vsel %vm346_vm13, %v656_v21, %v658_v23  ;;  %v508_v27 = vsel %vm346_vm13, %v504_v22, %v506_v17  ;;  %v507_v31 = vsel %vm346_vm13, %v502_v20, %v504_v22 }
 0x19c   : > { %710 = vmatprep.subr.mxu0 %v662_v24 }
 0x19d   : > { %711 = vmatpush1.msra.mxu0 %v661_v26 }
 0x19e   : > { %712 = vmatprep.subr.mxu0 %v508_v27  ;;  %v486_v29 = vpop.permute.xlu0 %485  ;;  %v638_v30 = vpop.permute.xlu1 %637 }
 0x19f   : > { %713 = vmatpush1.msra.mxu0 %v507_v31 }
 0x1a0   : > { %714 = vmatprep.subr.mxu0 %v348_v32 }
 0x1a1   : > { %715 = vmatpush1.msra.mxu0 %v347_v33 }
 0x1a2   : > { %v488_v34 = vpop.permute.xlu1 %487  ;;  %v484_v35 = vpop.permute.xlu0 %483 }
 0x1a3   : > { %v490_v39 = vsel %vm327_vm14, %v486_v29, %v488_v34  ;;  %v489_v42 = vsel %vm327_vm14, %v484_v35, %v486_v29 }
 0x1a6   : > { %v640_v36 = vpop.permute.xlu1 %639  ;;  %v326_v40 = vpop.permute.xlu0 %325 }
 0x1a7   : > { %v644_v37 = vsel %vm327_vm14, %v640_v36, %v642_v19  ;;  %v643_v38 = vsel %vm327_vm14, %v638_v30, %v640_v36 }
 0x1a8   : > { %716 = vmatprep.subr.mxu0 %v644_v37 }
 0x1a9   : > { %717 = vmatpush1.msra.mxu0 %v643_v38 }
 0x1aa   : > { %718 = vmatprep.subr.mxu0 %v490_v39  ;;  %v324_v41 = vpop.permute.xlu1 %323 }
 0x1ab   : > { %719 = vmatpush1.msra.mxu0 %v489_v42  ;;  %v329_v43 = vsel %vm327_vm14, %v324_v41, %v326_v40 }
 0x1ac   : > { %720 = vmatprep.subr.mxu0 %v329_v43 }
 0x1ae   : > { %v322_v44 = vpop.permute.xlu1 %321 }
 0x1af   : > { %v328_v45 = vsel %vm327_vm14, %v322_v44, %v324_v41 }
 0x1b0   : > { %721 = vmatpush1.msra.mxu0 %v328_v45 }
 0x1b1   : > { %722 = vmatprep.subr.mxu0 %v650_v10 }
 0x1b2   : > { %723 = vmatpush1.msra.mxu0 %v1380_v9 }
 0x1b3   : > { %724 = vmatprep.subr.mxu0 %v1357_v53  ;;  %v690_v47 = vpop.permute.xlu0 %689 }
 0x1b4   : > { %725 = vmatpush1.msra.mxu0 %v1355_v52 }
 0x1b5   : > { %726 = vmatprep.subr.mxu0 %v1328_v28 }
 0x1b6   : > { %727 = vmatpush1.msra.mxu0 %v1323_v25 }
 0x1b7   : > { %862 = vmatmul.mubr.msk.f32.vlgmr.msra.gmra.mxu0 %vm692_vm15, %v667_v46 }
 0x277   : > { %v762_v48 = vpop.f32.mrf.mxu0 }
 0x278   : > { %v763_v49 = vadd.f32 %v762_v48, %v690_v47 }
 0x279   : > { %v764_v50 = vpop.f32.mrf.mxu0 }
 0x27a   : > { %v767_v51 = vmax.f32 %v763_v49, 0.0  ;;  %v765_v52 = vadd.f32 %v764_v50, %v690_v47 }
 0x27c   : > { %769 = vst [vmem:[%s186_s26] sm:$0xff] %v767_v51  ;;  %v768_v53 = vmax.f32 %v765_v52, 0.0 }
 0x27e   : > { %770 = vst [vmem:[%s186_s26 + $0x8] sm:$0xff] %v768_v53 }
 0x27f   : > { %998 = shalt.err (!%p995_p10)
}
 0x280   : > { %s999_s11 = scalar_lea.hbm %s784_s6, 256  ;;  %s1003_s19 = scalar_lea.hbm %s1453_s3, 512 }
 0x281   : > { %p1000_p2 = scmp.ne.s32.totalorder %s784_s6, %s999_s11  ;;  %p1004_p7 = scmp.lt.s32.totalorder %s784_s6, %s1453_s3 }
 0x282   : > { %p1005_p5 = scmp.lt.s32.totalorder %s1003_s19, %s999_s11 }
 0x283   : > { %p1001_p4 = pnand %p1000_p2, %p1480_p12 }
 0x284   : > { %p1006_p6 = por %p1005_p5, %p1004_p7 }
 0x285   : > { %p1002_p9 = pneg %p1001_p4 }
 0x287   : > { %p1007_p11 = pnand %p1006_p6, %p1002_p9 }
 0x289   : > { %1010 = shalt.err (!%p1007_p11)
}
 0x28a   : > { %874 = dma.vmem_to_hbm [thread:$0]  (%p1480_p12), %s787_s27, 256, %s784_s6, %s772_s22  }
 0x28b PF: > { %s798_s29 = sand.u32 1, %s1037_s12   ;;  %p1481_p13 = scmp.ne.s32.totalorder %s1468_s24, 0 }
 0x28c   : > { %p1482_p0 = scmp.ge.s32.totalorder %s1049_s15, 2  ;;  %s799_s5 = scalar_lea.sflag [#allocation6], %s798_s29 }
 0x28e   : > { %p881_p1 = pnand %p1482_p0, %p1481_p13 }
 0x290   : > { %p882_p3 = pneg %p881_p1 }
 0x292   : > { %1032 = dma.done.wait (%p882_p3), %s799_s5, 256  }
 0x293   : > { %1034 = vsyncadd (%p882_p3), %s799_s5, 4294967040  ;;  %p16_p8 = scmp.ge.s32.totalorder %s1136_s18, 4   ;;  %s1483_s12 = smov %s1041_s13 }
 0x294   : > { %s1484_s13 = smov %s1045_s14  ;;  %s1485_s14 = smov %s1148_s21 }
 0x295   : > { %s1486_s15 = smov %s1136_s18  ;;  %18 = sbr.rel (!%p16_p8) target bundleno = 5 (0x5), region = 77 }
 0x29a   :  { %804 = vsyncpa [#allocation5], 1 }
 0x29b   :  { %806 = vsyncpa [#allocation5 + $0x1], 1 }
 0x29c   :  { %807 = vsyncpa [#allocation6], 1 }
 0x29d   :  { %809 = vsyncpa [#allocation6 + $0x1], 1 }

</bundles_post_ra>
